<compile_context>
chip_gen: v7x
topology: tpu7x:2x2x1
jax: 0.10.0
libtpu: 0.0.40
codegen_flags: <defaults>
</compile_context>

<pallas_src>
import math
from functools import partial

import jax
import jax.numpy as jnp
import numpy as np
from jax.experimental import pallas as pl
from jax.experimental.pallas import tpu as pltpu


def _layernorm(x, g, b, eps=1e-5):
    mu = jnp.mean(x, axis=-1, keepdims=True)
    var = jnp.mean((x - mu) ** 2, axis=-1, keepdims=True)
    return (x - mu) * jax.lax.rsqrt(var + eps) * g + b


def _gelu_new(x):
    # GPT2 "gelu_new" (tanh approximation)
    return 0.5 * x * (1.0 + jnp.tanh(math.sqrt(2.0 / math.pi) * (x + 0.044715 * x ** 3)))


def transformer_kernel(zs_ref, wpe_ref, wr_ref, br_ref, lnfg_ref, lnfb_ref,
                       ln1g_ref, ln1b_ref, wqkv_ref, bqkv_ref, wao_ref, bao_ref,
                       ln2g_ref, ln2b_ref, wfc_ref, bfc_ref, wmp_ref, bmp_ref,
                       h_out_ref, h_scr, ctx_scr, *, n_head):
    Bt, T, D = zs_ref.shape
    E = wpe_ref.shape[1]
    HD = E // n_head
    M = Bt * T
    scale = 1.0 / math.sqrt(HD)
    f32 = jnp.float32
    bf16 = jnp.bfloat16

    l = pl.program_id(1)

    # ---- l == 0: initialize the residual stream (read_in + positional embedding) ----
    @pl.when(l == 0)
    def _():
        x = zs_ref[...].reshape(M, D)                                   # bf16
        h0 = jnp.dot(x, wr_ref[...], preferred_element_type=f32) + br_ref[...]
        h0 = h0.reshape(Bt, T, E) + wpe_ref[...][None]                  # embd_pdrop = 0
        h_scr[...] = h0.reshape(M, E)                                   # f32 residual

    h = h_scr[...]

    # additive causal bias (hoisted out of the head loop): 0 where key <= query, else -1e30
    row = jax.lax.broadcasted_iota(jnp.int32, (T, T), 0)
    col = jax.lax.broadcasted_iota(jnp.int32, (T, T), 1)
    bias = jnp.where(row >= col, 0.0, -1e30).astype(f32)[None]          # (1, T, T)

    # ---- attention block (pre-LN) ----
    a_in = _layernorm(h, ln1g_ref[0], ln1b_ref[0])                      # f32
    qkv = jnp.dot(a_in.astype(bf16), wqkv_ref[0],
                  preferred_element_type=f32) + bqkv_ref[0]             # (M, 3E) f32
    qkv3 = qkv.reshape(Bt, T, 3 * E)

    for hh in range(n_head):
        # fold the 1/sqrt(HD) scale into q (on the small (Bt,T,HD) tensor)
        q_h = (qkv3[:, :, hh * HD:(hh + 1) * HD] * scale).astype(bf16)
        k_h = qkv3[:, :, E + hh * HD:E + (hh + 1) * HD].astype(bf16)
        v_h = qkv3[:, :, 2 * E + hh * HD:2 * E + (hh + 1) * HD].astype(bf16)
        s = jnp.einsum('bqd,bkd->bqk', q_h, k_h,
                       preferred_element_type=f32) + bias               # (Bt, T, T) f32
        s = s - jnp.max(s, axis=-1, keepdims=True)
        p = jnp.exp(s)
        p = p * pl.reciprocal(jnp.sum(p, axis=-1, keepdims=True), approx=True)
        ctx_h = jnp.einsum('bqk,bkd->bqd', p.astype(bf16), v_h,
                           preferred_element_type=f32)                  # (Bt, T, HD)
        # lane-dense context assembly -> enables one full-depth K=E out-projection
        ctx_scr[:, hh * HD:(hh + 1) * HD] = ctx_h.reshape(M, HD).astype(bf16)

    attn = jnp.dot(ctx_scr[...], wao_ref[0], preferred_element_type=f32) + bao_ref[0]
    h = h + attn

    # ---- MLP block (pre-LN) ----
    m_in = _layernorm(h, ln2g_ref[0], ln2b_ref[0])
    ff = jnp.dot(m_in.astype(bf16), wfc_ref[0], preferred_element_type=f32) + bfc_ref[0]
    ff = _gelu_new(ff)
    ff = jnp.dot(ff.astype(bf16), wmp_ref[0], preferred_element_type=f32) + bmp_ref[0]
    h = h + ff

    h_scr[...] = h

    # ---- last layer: final LN + lane-dense bf16 hidden-state writeback ----
    @pl.when(l == pl.num_programs(1) - 1)
    def _():
        hf = _layernorm(h, lnfg_ref[...], lnfb_ref[...])
        h_out_ref[...] = hf.reshape(Bt, T, E).astype(h_out_ref.dtype)


def _combine(xs, ys):
    """Interleave x's and y's: zs[:, 0::2] = xs, zs[:, 1::2, 0] = ys."""
    B, P, D = xs.shape
    zs = jnp.zeros((B, 2 * P, D), jnp.float32)
    zs = zs.at[:, 0::2, :].set(xs)
    zs = zs.at[:, 1::2, 0].set(ys)
    return zs


def transformer_forward(xs, ys, params, *, n_layer, n_head, inds=None, block_b=16):
    B, P, D = xs.shape
    T = 2 * P
    E = params["wpe"].shape[1]
    f32, bf16 = jnp.float32, jnp.bfloat16

    zs = _combine(xs, ys).astype(bf16)                                  # glue (JAX)

    # Batch blocking: Bt samples per grid step; pad batch to a multiple of Bt.
    Bt = min(block_b, B)
    Bp = ((B + Bt - 1) // Bt) * Bt
    if Bp != B:
        zs = jnp.concatenate([zs, jnp.zeros((Bp - B, T, D), zs.dtype)], axis=0)

    # Matmul weights in bf16 (MXU fast path); biases / LN params / wpe stay f32.
    wr = params["wr"].astype(bf16)
    wqkv = params["wqkv"].astype(bf16)
    wao = params["wao"].astype(bf16)
    wfc = params["wfc"].astype(bf16)
    wmp = params["wmp"].astype(bf16)

    def lay(a):
        # per-layer vectors -> (n_layer, 1, N) so block last-2 dims == full array dims
        return a.reshape(n_layer, 1, -1)

    operands = [
        zs, params["wpe"], wr, params["br"], params["lnfg"], params["lnfb"],
        lay(params["ln1g"]), lay(params["ln1b"]), wqkv, lay(params["bqkv"]),
        wao, lay(params["bao"]), lay(params["ln2g"]), lay(params["ln2b"]),
        wfc, lay(params["bfc"]), wmp, lay(params["bmp"]),
    ]

    def const_spec(a):
        nd = a.ndim
        return pl.BlockSpec(a.shape, lambda b, l, _n=nd: (0,) * _n)

    def layer_spec(a):
        nd = a.ndim                       # leading dim is n_layer
        return pl.BlockSpec((1,) + a.shape[1:],
                            lambda b, l, _n=nd: (l,) + (0,) * (_n - 1))

    in_specs = ([pl.BlockSpec((Bt, T, D), lambda b, l: (b, 0, 0))]
                + [const_spec(a) for a in operands[1:6]]
                + [layer_spec(a) for a in operands[6:]])

    kernel = partial(transformer_kernel, n_head=n_head)
    hidden = pl.pallas_call(
        kernel,
        out_shape=jax.ShapeDtypeStruct((Bp, T, E), bf16),
        grid=(Bp // Bt, n_layer),
        in_specs=in_specs,
        out_specs=pl.BlockSpec((Bt, T, E), lambda b, l: (b, 0, 0)),
        scratch_shapes=[pltpu.VMEM((Bt * T, E), f32),    # residual stream
                        pltpu.VMEM((Bt * T, E), bf16)],  # lane-dense attention context
        compiler_params=pltpu.CompilerParams(
            dimension_semantics=("parallel", "arbitrary"),   # batch || , layers sequential
            vmem_limit_bytes=56 * 1024 * 1024,               # fits v7x's 64 MiB VMEM
        ),
    )(*operands)

    hidden = hidden[:B].astype(f32)
    # read_out: Linear(n_embd -> 1) + even-position slice (glue, cheap in XLA).
    pred = (hidden @ params["wo"] + params["bo"])[:, 0::2, 0]            # (B, P)
    if inds is None:
        return pred
    return pred[:, jnp.asarray(inds)]


def reference_forward(xs, ys, params, n_layer, n_head):
    """Pure-JAX f32 reference replicating the GPT2 forward (for verification)."""
    B, P, D = xs.shape
    T = 2 * P
    E = params["wpe"].shape[1]
    HD = E // n_head
    zs = _combine(xs, ys)
    h = zs @ params["wr"] + params["br"]
    h = h + params["wpe"][None]
    mask = jnp.tril(jnp.ones((T, T), bool))
    for l in range(n_layer):
        a = _layernorm(h, params["ln1g"][l], params["ln1b"][l])
        qkv = a @ params["wqkv"][l] + params["bqkv"][l]
        q, k, v = jnp.split(qkv, 3, axis=-1)
        q = q.reshape(B, T, n_head, HD)
        k = k.reshape(B, T, n_head, HD)
        v = v.reshape(B, T, n_head, HD)
        s = jnp.einsum("bthd,bshd->bhts", q, k) / math.sqrt(HD)
        s = jnp.where(mask, s, -1e30)
        pr = jax.nn.softmax(s, axis=-1)
        ctx = jnp.einsum("bhts,bshd->bthd", pr, v).reshape(B, T, E)
        h = h + ctx @ params["wao"][l] + params["bao"][l]
        m = _layernorm(h, params["ln2g"][l], params["ln2b"][l])
        ff = _gelu_new(m @ params["wfc"][l] + params["bfc"][l])
        h = h + ff @ params["wmp"][l] + params["bmp"][l]
    h = _layernorm(h, params["lnfg"], params["lnfb"])
    out = h @ params["wo"] + params["bo"]
    return out[:, 0::2, 0]


def init_params(key, n_dims, n_embd, n_layer, T):
    ks = jax.random.split(key, 8)
    std = 0.02
    f = jnp.float32
    p = {
        "wr":   jax.random.normal(ks[0], (n_dims, n_embd), f) * std,
        "br":   jnp.zeros((1, n_embd), f),
        "wpe":  jax.random.normal(ks[1], (T, n_embd), f) * std,
        "ln1g": jnp.ones((n_layer, n_embd), f),
        "ln1b": jnp.zeros((n_layer, n_embd), f),
        "wqkv": jax.random.normal(ks[2], (n_layer, n_embd, 3 * n_embd), f) * std,
        "bqkv": jnp.zeros((n_layer, 3 * n_embd), f),
        "wao":  jax.random.normal(ks[3], (n_layer, n_embd, n_embd), f) * std,
        "bao":  jnp.zeros((n_layer, n_embd), f),
        "ln2g": jnp.ones((n_layer, n_embd), f),
        "ln2b": jnp.zeros((n_layer, n_embd), f),
        "wfc":  jax.random.normal(ks[4], (n_layer, n_embd, 4 * n_embd), f) * std,
        "bfc":  jnp.zeros((n_layer, 4 * n_embd), f),
        "wmp":  jax.random.normal(ks[5], (n_layer, 4 * n_embd, n_embd), f) * std,
        "bmp":  jnp.zeros((n_layer, n_embd), f),
        "lnfg": jnp.ones((1, n_embd), f),
        "lnfb": jnp.zeros((1, n_embd), f),
        "wo":   jax.random.normal(ks[6], (n_embd, 1), f) * std,
        "bo":   jnp.zeros((1, 1), f),
    }
    return p


if __name__ == "__main__":
    # Small shapes consistent with the module: n_dims=8, n_positions(points)=8,
    # n_embd=32, n_layer=2, n_head=4 -> interleaved sequence length T = 16.
    # batch=4 with block_b=2 exercises a (2 parallel) x (2 layer) grid; at production
    # shapes the default block_b=16 targets Bt*T >= 256 rows per step.
    B, P, D = 4, 8, 8
    n_embd, n_layer, n_head = 32, 2, 4
    T = 2 * P

    key = jax.random.PRNGKey(0)
    kx, ky, kp = jax.random.split(key, 3)
    xs = jax.random.normal(kx, (B, P, D), jnp.float32)
    ys = jax.random.normal(ky, (B, P), jnp.float32)
    params = init_params(kp, D, n_embd, n_layer, T)

    pred = transformer_forward(xs, ys, params, n_layer=n_layer, n_head=n_head, block_b=2)
    pred = jax.block_until_ready(pred)
    assert pred.shape == (B, P)

    ref = reference_forward(xs, ys, params, n_layer, n_head)
    # bf16 matmuls + bf16 hidden writeback + approx-reciprocal softmax: not bit-matching f32.
    np.testing.assert_allclose(np.asarray(pred), np.asarray(ref), atol=2e-2, rtol=2e-2)

    print("KERNEL_OK")
</pallas_src>

<mosaic_0001>
module attributes {stable_mosaic.version = 11 : i64} {
  func.func @transformer_kernel(%arg0: i32, %arg1: i32, %arg2: memref<2x16x8xbf16, #tpu.memory_space<vmem>>, %arg3: memref<16x32xf32, #tpu.memory_space<vmem>>, %arg4: memref<8x32xbf16, #tpu.memory_space<vmem>>, %arg5: memref<1x32xf32, #tpu.memory_space<vmem>>, %arg6: memref<1x32xf32, #tpu.memory_space<vmem>>, %arg7: memref<1x32xf32, #tpu.memory_space<vmem>>, %arg8: memref<1x1x32xf32, #tpu.memory_space<vmem>>, %arg9: memref<1x1x32xf32, #tpu.memory_space<vmem>>, %arg10: memref<1x32x96xbf16, #tpu.memory_space<vmem>>, %arg11: memref<1x1x96xf32, #tpu.memory_space<vmem>>, %arg12: memref<1x32x32xbf16, #tpu.memory_space<vmem>>, %arg13: memref<1x1x32xf32, #tpu.memory_space<vmem>>, %arg14: memref<1x1x32xf32, #tpu.memory_space<vmem>>, %arg15: memref<1x1x32xf32, #tpu.memory_space<vmem>>, %arg16: memref<1x32x128xbf16, #tpu.memory_space<vmem>>, %arg17: memref<1x1x128xf32, #tpu.memory_space<vmem>>, %arg18: memref<1x128x32xbf16, #tpu.memory_space<vmem>>, %arg19: memref<1x1x32xf32, #tpu.memory_space<vmem>>, %arg20: memref<2x16x32xbf16, #tpu.memory_space<vmem>>, %arg21: memref<32x32xf32, #tpu.memory_space<vmem>>, %arg22: memref<32x32xbf16, #tpu.memory_space<vmem>>) attributes {dimension_semantics = [#tpu.dimension_semantics<parallel>, #tpu.dimension_semantics<arbitrary>], iteration_bounds = array<i64: 2, 2>, scalar_prefetch = 0 : i64, scratch_operands = 2 : i64, tpu.core_type = #tpu.core_type<tc>, window_params = [{transform_indices = @transform_0, window_bounds = array<i64: 2, 16, 8>}, {pipeline_mode = #tpu.pipeline_mode<synchronous>, transform_indices = @transform_1, window_bounds = array<i64: 16, 32>}, {pipeline_mode = #tpu.pipeline_mode<synchronous>, transform_indices = @transform_2, window_bounds = array<i64: 8, 32>}, {pipeline_mode = #tpu.pipeline_mode<synchronous>, transform_indices = @transform_3, window_bounds = array<i64: 1, 32>}, {pipeline_mode = #tpu.pipeline_mode<synchronous>, transform_indices = @transform_4, window_bounds = array<i64: 1, 32>}, {pipeline_mode = #tpu.pipeline_mode<synchronous>, transform_indices = @transform_5, window_bounds = array<i64: 1, 32>}, {transform_indices = @transform_6, window_bounds = array<i64: 1, 1, 32>}, {transform_indices = @transform_7, window_bounds = array<i64: 1, 1, 32>}, {transform_indices = @transform_8, window_bounds = array<i64: 1, 32, 96>}, {transform_indices = @transform_9, window_bounds = array<i64: 1, 1, 96>}, {transform_indices = @transform_10, window_bounds = array<i64: 1, 32, 32>}, {transform_indices = @transform_11, window_bounds = array<i64: 1, 1, 32>}, {transform_indices = @transform_12, window_bounds = array<i64: 1, 1, 32>}, {transform_indices = @transform_13, window_bounds = array<i64: 1, 1, 32>}, {transform_indices = @transform_14, window_bounds = array<i64: 1, 32, 128>}, {transform_indices = @transform_15, window_bounds = array<i64: 1, 1, 128>}, {transform_indices = @transform_16, window_bounds = array<i64: 1, 128, 32>}, {transform_indices = @transform_17, window_bounds = array<i64: 1, 1, 32>}, {transform_indices = @transform_18, window_bounds = array<i64: 2, 16, 32>}]} {
    %c0_i32 = arith.constant 0 : i32
    %0 = arith.cmpi eq, %arg1, %c0_i32 : i32
    %1 = arith.extui %0 : i1 to i32
    %c0_i32_0 = arith.constant 0 : i32
    %2 = arith.cmpi ne, %1, %c0_i32_0 : i32
    scf.if %2 {
      %c0_87 = arith.constant 0 : index
      %c0_88 = arith.constant 0 : index
      %c0_89 = arith.constant 0 : index
      %219 = vector.load %arg2[%c0_87, %c0_88, %c0_89] : memref<2x16x8xbf16, #tpu.memory_space<vmem>>, vector<2x16x8xbf16>
      %220 = vector.shape_cast %219 : vector<2x16x8xbf16> to vector<32x8xbf16>
      %c0_90 = arith.constant 0 : index
      %c0_91 = arith.constant 0 : index
      %221 = vector.load %arg4[%c0_90, %c0_91] : memref<8x32xbf16, #tpu.memory_space<vmem>>, vector<8x32xbf16>
      %cst_92 = arith.constant dense<0.000000e+00> : vector<32x32xf32>
      %222 = tpu.matmul %220, %221, %cst_92 {dimension_numbers = #tpu.dot_dimension_numbers<[1], [0], [0], [1], [0, 0, 1, 1], [], []>} : vector<32x8xbf16>, vector<8x32xbf16>, vector<32x32xf32> -> vector<32x32xf32>
      %c0_93 = arith.constant 0 : index
      %c0_94 = arith.constant 0 : index
      %223 = vector.load %arg5[%c0_93, %c0_94] : memref<1x32xf32, #tpu.memory_space<vmem>>, vector<1x32xf32>
      %224 = vector.broadcast %223 : vector<1x32xf32> to vector<32x32xf32>
      %225 = arith.addf %222, %224 : vector<32x32xf32>
      %226 = vector.shape_cast %225 : vector<32x32xf32> to vector<2x16x32xf32>
      %c0_95 = arith.constant 0 : index
      %c0_96 = arith.constant 0 : index
      %227 = vector.load %arg3[%c0_95, %c0_96] : memref<16x32xf32, #tpu.memory_space<vmem>>, vector<16x32xf32>
      %228 = vector.shape_cast %227 : vector<16x32xf32> to vector<1x16x32xf32>
      %229 = vector.broadcast %228 : vector<1x16x32xf32> to vector<2x16x32xf32>
      %230 = arith.addf %226, %229 : vector<2x16x32xf32>
      %231 = vector.shape_cast %230 : vector<2x16x32xf32> to vector<32x32xf32>
      %c0_97 = arith.constant 0 : index
      %c0_98 = arith.constant 0 : index
      %232 = vector.load %arg21[%c0_97, %c0_98] : memref<32x32xf32, #tpu.memory_space<vmem>>, vector<32x32xf32>
      tpu.vector_store %arg21[%c0_97, %c0_98], %231 {strides = array<i32>} : memref<32x32xf32, #tpu.memory_space<vmem>>, vector<32x32xf32>,
    } else {
    }
    %c0 = arith.constant 0 : index
    %c0_1 = arith.constant 0 : index
    %3 = vector.load %arg21[%c0, %c0_1] : memref<32x32xf32, #tpu.memory_space<vmem>>, vector<32x32xf32>
    %4 = tpu.iota {dimensions = array<i32: 0>} : vector<16x16xi32>
    %5 = tpu.iota {dimensions = array<i32: 1>} : vector<16x16xi32>
    %6 = arith.cmpi sge, %4, %5 : vector<16x16xi32>
    %cst = arith.constant 0.000000e+00 : f32
    %cst_2 = arith.constant -1.000000e+30 : f32
    %7 = vector.broadcast %cst : f32 to vector<16x16xf32>
    %8 = vector.broadcast %cst_2 : f32 to vector<16x16xf32>
    %9 = arith.select %6, %7, %8 : vector<16x16xi1>, vector<16x16xf32>
    %10 = vector.shape_cast %9 : vector<16x16xf32> to vector<1x16x16xf32>
    %c0_3 = arith.constant 0 : index
    %c0_4 = arith.constant 0 : index
    %c0_5 = arith.constant 0 : index
    %11 = vector.load %arg8[%c0_3, %c0_4, %c0_5] : memref<1x1x32xf32, #tpu.memory_space<vmem>>, vector<1x1x32xf32>
    %12 = vector.shape_cast %11 : vector<1x1x32xf32> to vector<1x32xf32>
    %c0_6 = arith.constant 0 : index
    %c0_7 = arith.constant 0 : index
    %c0_8 = arith.constant 0 : index
    %13 = vector.load %arg9[%c0_6, %c0_7, %c0_8] : memref<1x1x32xf32, #tpu.memory_space<vmem>>, vector<1x1x32xf32>
    %14 = vector.shape_cast %13 : vector<1x1x32xf32> to vector<1x32xf32>
    %cst_9 = arith.constant dense<0.000000e+00> : vector<32xf32>
    %15 = vector.multi_reduction <add>, %3, %cst_9 [1] : vector<32x32xf32> to vector<32xf32>
    %16 = vector.shape_cast %15 : vector<32xf32> to vector<32x1xf32>
    %cst_10 = arith.constant 3.200000e+01 : f32
    %17 = vector.broadcast %cst_10 : f32 to vector<32x1xf32>
    %18 = arith.divf %16, %17 : vector<32x1xf32>
    %19 = vector.broadcast %18 : vector<32x1xf32> to vector<32x32xf32>
    %20 = arith.subf %3, %19 : vector<32x32xf32>
    %21 = arith.mulf %20, %20 : vector<32x32xf32>
    %cst_11 = arith.constant dense<0.000000e+00> : vector<32xf32>
    %22 = vector.multi_reduction <add>, %21, %cst_11 [1] : vector<32x32xf32> to vector<32xf32>
    %23 = vector.shape_cast %22 : vector<32xf32> to vector<32x1xf32>
    %cst_12 = arith.constant 3.200000e+01 : f32
    %24 = vector.broadcast %cst_12 : f32 to vector<32x1xf32>
    %25 = arith.divf %23, %24 : vector<32x1xf32>
    %26 = vector.broadcast %18 : vector<32x1xf32> to vector<32x32xf32>
    %27 = arith.subf %3, %26 : vector<32x32xf32>
    %cst_13 = arith.constant 9.99999974E-6 : f32
    %28 = vector.broadcast %cst_13 : f32 to vector<32x1xf32>
    %29 = arith.addf %25, %28 : vector<32x1xf32>
    %30 = math.rsqrt %29 : vector<32x1xf32>
    %31 = vector.broadcast %30 : vector<32x1xf32> to vector<32x32xf32>
    %32 = arith.mulf %27, %31 : vector<32x32xf32>
    %33 = vector.broadcast %12 : vector<1x32xf32> to vector<32x32xf32>
    %34 = arith.mulf %32, %33 : vector<32x32xf32>
    %35 = vector.broadcast %14 : vector<1x32xf32> to vector<32x32xf32>
    %36 = arith.addf %34, %35 : vector<32x32xf32>
    %37 = arith.truncf %36 : vector<32x32xf32> to vector<32x32xbf16>
    %c0_14 = arith.constant 0 : index
    %c0_15 = arith.constant 0 : index
    %c0_16 = arith.constant 0 : index
    %38 = vector.load %arg10[%c0_14, %c0_15, %c0_16] : memref<1x32x96xbf16, #tpu.memory_space<vmem>>, vector<1x32x96xbf16>
    %39 = vector.shape_cast %38 : vector<1x32x96xbf16> to vector<32x96xbf16>
    %cst_17 = arith.constant dense<0.000000e+00> : vector<32x96xf32>
    %40 = tpu.matmul %37, %39, %cst_17 {dimension_numbers = #tpu.dot_dimension_numbers<[1], [0], [0], [1], [0, 0, 1, 1], [], []>} : vector<32x32xbf16>, vector<32x96xbf16>, vector<32x96xf32> -> vector<32x96xf32>
    %c0_18 = arith.constant 0 : index
    %c0_19 = arith.constant 0 : index
    %c0_20 = arith.constant 0 : index
    %41 = vector.load %arg11[%c0_18, %c0_19, %c0_20] : memref<1x1x96xf32, #tpu.memory_space<vmem>>, vector<1x1x96xf32>
    %42 = vector.shape_cast %41 : vector<1x1x96xf32> to vector<1x96xf32>
    %43 = vector.broadcast %42 : vector<1x96xf32> to vector<32x96xf32>
    %44 = arith.addf %40, %43 : vector<32x96xf32>
    %45 = vector.shape_cast %44 : vector<32x96xf32> to vector<2x16x96xf32>
    %46 = vector.extract_strided_slice %45 {offsets = [0, 0, 0], sizes = [2, 16, 8], strides = [1, 1, 1]} : vector<2x16x96xf32> to vector<2x16x8xf32>
    %cst_21 = arith.constant 0.353553385 : f32
    %47 = vector.broadcast %cst_21 : f32 to vector<2x16x8xf32>
    %48 = arith.mulf %46, %47 : vector<2x16x8xf32>
    %49 = arith.truncf %48 : vector<2x16x8xf32> to vector<2x16x8xbf16>
    %50 = vector.extract_strided_slice %45 {offsets = [0, 0, 32], sizes = [2, 16, 8], strides = [1, 1, 1]} : vector<2x16x96xf32> to vector<2x16x8xf32>
    %51 = arith.truncf %50 : vector<2x16x8xf32> to vector<2x16x8xbf16>
    %52 = vector.extract_strided_slice %45 {offsets = [0, 0, 64], sizes = [2, 16, 8], strides = [1, 1, 1]} : vector<2x16x96xf32> to vector<2x16x8xf32>
    %53 = arith.truncf %52 : vector<2x16x8xf32> to vector<2x16x8xbf16>
    "tpu.trace_start"() <{level = 10 : i32, message = "bqd,bkd->bqk"}> : () -> ()
    %cst_22 = arith.constant dense<0.000000e+00> : vector<2x16x16xf32>
    %54 = tpu.matmul %49, %51, %cst_22 {dimension_numbers = #tpu.dot_dimension_numbers<[2], [2], [1], [1], [0, 0, 0, 1, 1, 1], [0], [0]>} : vector<2x16x8xbf16>, vector<2x16x8xbf16>, vector<2x16x16xf32> -> vector<2x16x16xf32>
    "tpu.trace_stop"() : () -> ()
    %55 = vector.broadcast %10 : vector<1x16x16xf32> to vector<2x16x16xf32>
    %56 = arith.addf %54, %55 : vector<2x16x16xf32>
    %cst_23 = arith.constant dense<0xFF800000> : vector<2x16xf32>
    %57 = vector.multi_reduction <maximumf>, %56, %cst_23 [2] : vector<2x16x16xf32> to vector<2x16xf32>
    %58 = vector.shape_cast %57 : vector<2x16xf32> to vector<2x16x1xf32>
    %59 = vector.broadcast %58 : vector<2x16x1xf32> to vector<2x16x16xf32>
    %60 = arith.subf %56, %59 : vector<2x16x16xf32>
    %61 = math.exp %60 : vector<2x16x16xf32>
    %cst_24 = arith.constant dense<0.000000e+00> : vector<2x16xf32>
    %62 = vector.multi_reduction <add>, %61, %cst_24 [2] : vector<2x16x16xf32> to vector<2x16xf32>
    %63 = vector.shape_cast %62 : vector<2x16xf32> to vector<2x16x1xf32>
    %64 = tpu.reciprocal %63 {approx = true} : vector<2x16x1xf32> -> vector<2x16x1xf32>
    %65 = vector.broadcast %64 : vector<2x16x1xf32> to vector<2x16x16xf32>
    %66 = arith.mulf %61, %65 : vector<2x16x16xf32>
    %67 = arith.truncf %66 : vector<2x16x16xf32> to vector<2x16x16xbf16>
    "tpu.trace_start"() <{level = 10 : i32, message = "bqk,bkd->bqd"}> : () -> ()
    %cst_25 = arith.constant dense<0.000000e+00> : vector<2x16x8xf32>
    %68 = tpu.matmul %67, %53, %cst_25 {dimension_numbers = #tpu.dot_dimension_numbers<[2], [1], [1], [2], [0, 0, 0, 1, 1, 2], [0], [0]>} : vector<2x16x16xbf16>, vector<2x16x8xbf16>, vector<2x16x8xf32> -> vector<2x16x8xf32>
    "tpu.trace_stop"() : () -> ()
    %69 = vector.shape_cast %68 : vector<2x16x8xf32> to vector<32x8xf32>
    %70 = arith.truncf %69 : vector<32x8xf32> to vector<32x8xbf16>
    %c0_26 = arith.constant 0 : index
    %c0_27 = arith.constant 0 : index
    %71 = vector.load %arg22[%c0_26, %c0_27] : memref<32x32xbf16, #tpu.memory_space<vmem>>, vector<32x8xbf16>
    tpu.vector_store %arg22[%c0_26, %c0_27], %70 {strides = array<i32>} : memref<32x32xbf16, #tpu.memory_space<vmem>>, vector<32x8xbf16>,
    %72 = vector.extract_strided_slice %45 {offsets = [0, 0, 8], sizes = [2, 16, 8], strides = [1, 1, 1]} : vector<2x16x96xf32> to vector<2x16x8xf32>
    %cst_28 = arith.constant 0.353553385 : f32
    %73 = vector.broadcast %cst_28 : f32 to vector<2x16x8xf32>
    %74 = arith.mulf %72, %73 : vector<2x16x8xf32>
    %75 = arith.truncf %74 : vector<2x16x8xf32> to vector<2x16x8xbf16>
    %76 = vector.extract_strided_slice %45 {offsets = [0, 0, 40], sizes = [2, 16, 8], strides = [1, 1, 1]} : vector<2x16x96xf32> to vector<2x16x8xf32>
    %77 = arith.truncf %76 : vector<2x16x8xf32> to vector<2x16x8xbf16>
    %78 = vector.extract_strided_slice %45 {offsets = [0, 0, 72], sizes = [2, 16, 8], strides = [1, 1, 1]} : vector<2x16x96xf32> to vector<2x16x8xf32>
    %79 = arith.truncf %78 : vector<2x16x8xf32> to vector<2x16x8xbf16>
    "tpu.trace_start"() <{level = 10 : i32, message = "bqd,bkd->bqk"}> : () -> ()
    %cst_29 = arith.constant dense<0.000000e+00> : vector<2x16x16xf32>
    %80 = tpu.matmul %75, %77, %cst_29 {dimension_numbers = #tpu.dot_dimension_numbers<[2], [2], [1], [1], [0, 0, 0, 1, 1, 1], [0], [0]>} : vector<2x16x8xbf16>, vector<2x16x8xbf16>, vector<2x16x16xf32> -> vector<2x16x16xf32>
    "tpu.trace_stop"() : () -> ()
    %81 = vector.broadcast %10 : vector<1x16x16xf32> to vector<2x16x16xf32>
    %82 = arith.addf %80, %81 : vector<2x16x16xf32>
    %cst_30 = arith.constant dense<0xFF800000> : vector<2x16xf32>
    %83 = vector.multi_reduction <maximumf>, %82, %cst_30 [2] : vector<2x16x16xf32> to vector<2x16xf32>
    %84 = vector.shape_cast %83 : vector<2x16xf32> to vector<2x16x1xf32>
    %85 = vector.broadcast %84 : vector<2x16x1xf32> to vector<2x16x16xf32>
    %86 = arith.subf %82, %85 : vector<2x16x16xf32>
    %87 = math.exp %86 : vector<2x16x16xf32>
    %cst_31 = arith.constant dense<0.000000e+00> : vector<2x16xf32>
    %88 = vector.multi_reduction <add>, %87, %cst_31 [2] : vector<2x16x16xf32> to vector<2x16xf32>
    %89 = vector.shape_cast %88 : vector<2x16xf32> to vector<2x16x1xf32>
    %90 = tpu.reciprocal %89 {approx = true} : vector<2x16x1xf32> -> vector<2x16x1xf32>
    %91 = vector.broadcast %90 : vector<2x16x1xf32> to vector<2x16x16xf32>
    %92 = arith.mulf %87, %91 : vector<2x16x16xf32>
    %93 = arith.truncf %92 : vector<2x16x16xf32> to vector<2x16x16xbf16>
    "tpu.trace_start"() <{level = 10 : i32, message = "bqk,bkd->bqd"}> : () -> ()
    %cst_32 = arith.constant dense<0.000000e+00> : vector<2x16x8xf32>
    %94 = tpu.matmul %93, %79, %cst_32 {dimension_numbers = #tpu.dot_dimension_numbers<[2], [1], [1], [2], [0, 0, 0, 1, 1, 2], [0], [0]>} : vector<2x16x16xbf16>, vector<2x16x8xbf16>, vector<2x16x8xf32> -> vector<2x16x8xf32>
    "tpu.trace_stop"() : () -> ()
    %95 = vector.shape_cast %94 : vector<2x16x8xf32> to vector<32x8xf32>
    %96 = arith.truncf %95 : vector<32x8xf32> to vector<32x8xbf16>
    %c0_33 = arith.constant 0 : index
    %c8 = arith.constant 8 : index
    %97 = vector.load %arg22[%c0_33, %c8] : memref<32x32xbf16, #tpu.memory_space<vmem>>, vector<32x8xbf16>
    tpu.vector_store %arg22[%c0_33, %c8], %96 {strides = array<i32>} : memref<32x32xbf16, #tpu.memory_space<vmem>>, vector<32x8xbf16>,
    %98 = vector.extract_strided_slice %45 {offsets = [0, 0, 16], sizes = [2, 16, 8], strides = [1, 1, 1]} : vector<2x16x96xf32> to vector<2x16x8xf32>
    %cst_34 = arith.constant 0.353553385 : f32
    %99 = vector.broadcast %cst_34 : f32 to vector<2x16x8xf32>
    %100 = arith.mulf %98, %99 : vector<2x16x8xf32>
    %101 = arith.truncf %100 : vector<2x16x8xf32> to vector<2x16x8xbf16>
    %102 = vector.extract_strided_slice %45 {offsets = [0, 0, 48], sizes = [2, 16, 8], strides = [1, 1, 1]} : vector<2x16x96xf32> to vector<2x16x8xf32>
    %103 = arith.truncf %102 : vector<2x16x8xf32> to vector<2x16x8xbf16>
    %104 = vector.extract_strided_slice %45 {offsets = [0, 0, 80], sizes = [2, 16, 8], strides = [1, 1, 1]} : vector<2x16x96xf32> to vector<2x16x8xf32>
    %105 = arith.truncf %104 : vector<2x16x8xf32> to vector<2x16x8xbf16>
    "tpu.trace_start"() <{level = 10 : i32, message = "bqd,bkd->bqk"}> : () -> ()
    %cst_35 = arith.constant dense<0.000000e+00> : vector<2x16x16xf32>
    %106 = tpu.matmul %101, %103, %cst_35 {dimension_numbers = #tpu.dot_dimension_numbers<[2], [2], [1], [1], [0, 0, 0, 1, 1, 1], [0], [0]>} : vector<2x16x8xbf16>, vector<2x16x8xbf16>, vector<2x16x16xf32> -> vector<2x16x16xf32>
    "tpu.trace_stop"() : () -> ()
    %107 = vector.broadcast %10 : vector<1x16x16xf32> to vector<2x16x16xf32>
    %108 = arith.addf %106, %107 : vector<2x16x16xf32>
    %cst_36 = arith.constant dense<0xFF800000> : vector<2x16xf32>
    %109 = vector.multi_reduction <maximumf>, %108, %cst_36 [2] : vector<2x16x16xf32> to vector<2x16xf32>
    %110 = vector.shape_cast %109 : vector<2x16xf32> to vector<2x16x1xf32>
    %111 = vector.broadcast %110 : vector<2x16x1xf32> to vector<2x16x16xf32>
    %112 = arith.subf %108, %111 : vector<2x16x16xf32>
    %113 = math.exp %112 : vector<2x16x16xf32>
    %cst_37 = arith.constant dense<0.000000e+00> : vector<2x16xf32>
    %114 = vector.multi_reduction <add>, %113, %cst_37 [2] : vector<2x16x16xf32> to vector<2x16xf32>
    %115 = vector.shape_cast %114 : vector<2x16xf32> to vector<2x16x1xf32>
    %116 = tpu.reciprocal %115 {approx = true} : vector<2x16x1xf32> -> vector<2x16x1xf32>
    %117 = vector.broadcast %116 : vector<2x16x1xf32> to vector<2x16x16xf32>
    %118 = arith.mulf %113, %117 : vector<2x16x16xf32>
    %119 = arith.truncf %118 : vector<2x16x16xf32> to vector<2x16x16xbf16>
    "tpu.trace_start"() <{level = 10 : i32, message = "bqk,bkd->bqd"}> : () -> ()
    %cst_38 = arith.constant dense<0.000000e+00> : vector<2x16x8xf32>
    %120 = tpu.matmul %119, %105, %cst_38 {dimension_numbers = #tpu.dot_dimension_numbers<[2], [1], [1], [2], [0, 0, 0, 1, 1, 2], [0], [0]>} : vector<2x16x16xbf16>, vector<2x16x8xbf16>, vector<2x16x8xf32> -> vector<2x16x8xf32>
    "tpu.trace_stop"() : () -> ()
    %121 = vector.shape_cast %120 : vector<2x16x8xf32> to vector<32x8xf32>
    %122 = arith.truncf %121 : vector<32x8xf32> to vector<32x8xbf16>
    %c0_39 = arith.constant 0 : index
    %c16 = arith.constant 16 : index
    %123 = vector.load %arg22[%c0_39, %c16] : memref<32x32xbf16, #tpu.memory_space<vmem>>, vector<32x8xbf16>
    tpu.vector_store %arg22[%c0_39, %c16], %122 {strides = array<i32>} : memref<32x32xbf16, #tpu.memory_space<vmem>>, vector<32x8xbf16>,
    %124 = vector.extract_strided_slice %45 {offsets = [0, 0, 24], sizes = [2, 16, 8], strides = [1, 1, 1]} : vector<2x16x96xf32> to vector<2x16x8xf32>
    %cst_40 = arith.constant 0.353553385 : f32
    %125 = vector.broadcast %cst_40 : f32 to vector<2x16x8xf32>
    %126 = arith.mulf %124, %125 : vector<2x16x8xf32>
    %127 = arith.truncf %126 : vector<2x16x8xf32> to vector<2x16x8xbf16>
    %128 = vector.extract_strided_slice %45 {offsets = [0, 0, 56], sizes = [2, 16, 8], strides = [1, 1, 1]} : vector<2x16x96xf32> to vector<2x16x8xf32>
    %129 = arith.truncf %128 : vector<2x16x8xf32> to vector<2x16x8xbf16>
    %130 = vector.extract_strided_slice %45 {offsets = [0, 0, 88], sizes = [2, 16, 8], strides = [1, 1, 1]} : vector<2x16x96xf32> to vector<2x16x8xf32>
    %131 = arith.truncf %130 : vector<2x16x8xf32> to vector<2x16x8xbf16>
    "tpu.trace_start"() <{level = 10 : i32, message = "bqd,bkd->bqk"}> : () -> ()
    %cst_41 = arith.constant dense<0.000000e+00> : vector<2x16x16xf32>
    %132 = tpu.matmul %127, %129, %cst_41 {dimension_numbers = #tpu.dot_dimension_numbers<[2], [2], [1], [1], [0, 0, 0, 1, 1, 1], [0], [0]>} : vector<2x16x8xbf16>, vector<2x16x8xbf16>, vector<2x16x16xf32> -> vector<2x16x16xf32>
    "tpu.trace_stop"() : () -> ()
    %133 = vector.broadcast %10 : vector<1x16x16xf32> to vector<2x16x16xf32>
    %134 = arith.addf %132, %133 : vector<2x16x16xf32>
    %cst_42 = arith.constant dense<0xFF800000> : vector<2x16xf32>
    %135 = vector.multi_reduction <maximumf>, %134, %cst_42 [2] : vector<2x16x16xf32> to vector<2x16xf32>
    %136 = vector.shape_cast %135 : vector<2x16xf32> to vector<2x16x1xf32>
    %137 = vector.broadcast %136 : vector<2x16x1xf32> to vector<2x16x16xf32>
    %138 = arith.subf %134, %137 : vector<2x16x16xf32>
    %139 = math.exp %138 : vector<2x16x16xf32>
    %cst_43 = arith.constant dense<0.000000e+00> : vector<2x16xf32>
    %140 = vector.multi_reduction <add>, %139, %cst_43 [2] : vector<2x16x16xf32> to vector<2x16xf32>
    %141 = vector.shape_cast %140 : vector<2x16xf32> to vector<2x16x1xf32>
    %142 = tpu.reciprocal %141 {approx = true} : vector<2x16x1xf32> -> vector<2x16x1xf32>
    %143 = vector.broadcast %142 : vector<2x16x1xf32> to vector<2x16x16xf32>
    %144 = arith.mulf %139, %143 : vector<2x16x16xf32>
    %145 = arith.truncf %144 : vector<2x16x16xf32> to vector<2x16x16xbf16>
    "tpu.trace_start"() <{level = 10 : i32, message = "bqk,bkd->bqd"}> : () -> ()
    %cst_44 = arith.constant dense<0.000000e+00> : vector<2x16x8xf32>
    %146 = tpu.matmul %145, %131, %cst_44 {dimension_numbers = #tpu.dot_dimension_numbers<[2], [1], [1], [2], [0, 0, 0, 1, 1, 2], [0], [0]>} : vector<2x16x16xbf16>, vector<2x16x8xbf16>, vector<2x16x8xf32> -> vector<2x16x8xf32>
    "tpu.trace_stop"() : () -> ()
    %147 = vector.shape_cast %146 : vector<2x16x8xf32> to vector<32x8xf32>
    %148 = arith.truncf %147 : vector<32x8xf32> to vector<32x8xbf16>
    %c0_45 = arith.constant 0 : index
    %c24 = arith.constant 24 : index
    %149 = vector.load %arg22[%c0_45, %c24] : memref<32x32xbf16, #tpu.memory_space<vmem>>, vector<32x8xbf16>
    tpu.vector_store %arg22[%c0_45, %c24], %148 {strides = array<i32>} : memref<32x32xbf16, #tpu.memory_space<vmem>>, vector<32x8xbf16>,
    %c0_46 = arith.constant 0 : index
    %c0_47 = arith.constant 0 : index
    %150 = vector.load %arg22[%c0_46, %c0_47] : memref<32x32xbf16, #tpu.memory_space<vmem>>, vector<32x32xbf16>
    %c0_48 = arith.constant 0 : index
    %c0_49 = arith.constant 0 : index
    %c0_50 = arith.constant 0 : index
    %151 = vector.load %arg12[%c0_48, %c0_49, %c0_50] : memref<1x32x32xbf16, #tpu.memory_space<vmem>>, vector<1x32x32xbf16>
    %152 = vector.shape_cast %151 : vector<1x32x32xbf16> to vector<32x32xbf16>
    %cst_51 = arith.constant dense<0.000000e+00> : vector<32x32xf32>
    %153 = tpu.matmul %150, %152, %cst_51 {dimension_numbers = #tpu.dot_dimension_numbers<[1], [0], [0], [1], [0, 0, 1, 1], [], []>} : vector<32x32xbf16>, vector<32x32xbf16>, vector<32x32xf32> -> vector<32x32xf32>
    %c0_52 = arith.constant 0 : index
    %c0_53 = arith.constant 0 : index
    %c0_54 = arith.constant 0 : index
    %154 = vector.load %arg13[%c0_52, %c0_53, %c0_54] : memref<1x1x32xf32, #tpu.memory_space<vmem>>, vector<1x1x32xf32>
    %155 = vector.shape_cast %154 : vector<1x1x32xf32> to vector<1x32xf32>
    %156 = vector.broadcast %155 : vector<1x32xf32> to vector<32x32xf32>
    %157 = arith.addf %153, %156 : vector<32x32xf32>
    %158 = arith.addf %3, %157 : vector<32x32xf32>
    %c0_55 = arith.constant 0 : index
    %c0_56 = arith.constant 0 : index
    %c0_57 = arith.constant 0 : index
    %159 = vector.load %arg14[%c0_55, %c0_56, %c0_57] : memref<1x1x32xf32, #tpu.memory_space<vmem>>, vector<1x1x32xf32>
    %160 = vector.shape_cast %159 : vector<1x1x32xf32> to vector<1x32xf32>
    %c0_58 = arith.constant 0 : index
    %c0_59 = arith.constant 0 : index
    %c0_60 = arith.constant 0 : index
    %161 = vector.load %arg15[%c0_58, %c0_59, %c0_60] : memref<1x1x32xf32, #tpu.memory_space<vmem>>, vector<1x1x32xf32>
    %162 = vector.shape_cast %161 : vector<1x1x32xf32> to vector<1x32xf32>
    %cst_61 = arith.constant dense<0.000000e+00> : vector<32xf32>
    %163 = vector.multi_reduction <add>, %158, %cst_61 [1] : vector<32x32xf32> to vector<32xf32>
    %164 = vector.shape_cast %163 : vector<32xf32> to vector<32x1xf32>
    %cst_62 = arith.constant 3.200000e+01 : f32
    %165 = vector.broadcast %cst_62 : f32 to vector<32x1xf32>
    %166 = arith.divf %164, %165 : vector<32x1xf32>
    %167 = vector.broadcast %166 : vector<32x1xf32> to vector<32x32xf32>
    %168 = arith.subf %158, %167 : vector<32x32xf32>
    %169 = arith.mulf %168, %168 : vector<32x32xf32>
    %cst_63 = arith.constant dense<0.000000e+00> : vector<32xf32>
    %170 = vector.multi_reduction <add>, %169, %cst_63 [1] : vector<32x32xf32> to vector<32xf32>
    %171 = vector.shape_cast %170 : vector<32xf32> to vector<32x1xf32>
    %cst_64 = arith.constant 3.200000e+01 : f32
    %172 = vector.broadcast %cst_64 : f32 to vector<32x1xf32>
    %173 = arith.divf %171, %172 : vector<32x1xf32>
    %174 = vector.broadcast %166 : vector<32x1xf32> to vector<32x32xf32>
    %175 = arith.subf %158, %174 : vector<32x32xf32>
    %cst_65 = arith.constant 9.99999974E-6 : f32
    %176 = vector.broadcast %cst_65 : f32 to vector<32x1xf32>
    %177 = arith.addf %173, %176 : vector<32x1xf32>
    %178 = math.rsqrt %177 : vector<32x1xf32>
    %179 = vector.broadcast %178 : vector<32x1xf32> to vector<32x32xf32>
    %180 = arith.mulf %175, %179 : vector<32x32xf32>
    %181 = vector.broadcast %160 : vector<1x32xf32> to vector<32x32xf32>
    %182 = arith.mulf %180, %181 : vector<32x32xf32>
    %183 = vector.broadcast %162 : vector<1x32xf32> to vector<32x32xf32>
    %184 = arith.addf %182, %183 : vector<32x32xf32>
    %185 = arith.truncf %184 : vector<32x32xf32> to vector<32x32xbf16>
    %c0_66 = arith.constant 0 : index
    %c0_67 = arith.constant 0 : index
    %c0_68 = arith.constant 0 : index
    %186 = vector.load %arg16[%c0_66, %c0_67, %c0_68] : memref<1x32x128xbf16, #tpu.memory_space<vmem>>, vector<1x32x128xbf16>
    %187 = vector.shape_cast %186 : vector<1x32x128xbf16> to vector<32x128xbf16>
    %cst_69 = arith.constant dense<0.000000e+00> : vector<32x128xf32>
    %188 = tpu.matmul %185, %187, %cst_69 {dimension_numbers = #tpu.dot_dimension_numbers<[1], [0], [0], [1], [0, 0, 1, 1], [], []>} : vector<32x32xbf16>, vector<32x128xbf16>, vector<32x128xf32> -> vector<32x128xf32>
    %c0_70 = arith.constant 0 : index
    %c0_71 = arith.constant 0 : index
    %c0_72 = arith.constant 0 : index
    %189 = vector.load %arg17[%c0_70, %c0_71, %c0_72] : memref<1x1x128xf32, #tpu.memory_space<vmem>>, vector<1x1x128xf32>
    %190 = vector.shape_cast %189 : vector<1x1x128xf32> to vector<1x128xf32>
    %191 = vector.broadcast %190 : vector<1x128xf32> to vector<32x128xf32>
    %192 = arith.addf %188, %191 : vector<32x128xf32>
    %cst_73 = arith.constant 5.000000e-01 : f32
    %193 = vector.broadcast %cst_73 : f32 to vector<32x128xf32>
    %194 = arith.mulf %193, %192 : vector<32x128xf32>
    %195 = arith.mulf %192, %192 : vector<32x128xf32>
    %196 = arith.mulf %192, %195 : vector<32x128xf32>
    %cst_74 = arith.constant 4.471500e-02 : f32
    %197 = vector.broadcast %cst_74 : f32 to vector<32x128xf32>
    %198 = arith.mulf %197, %196 : vector<32x128xf32>
    %199 = arith.addf %192, %198 : vector<32x128xf32>
    %cst_75 = arith.constant 0.797884583 : f32
    %200 = vector.broadcast %cst_75 : f32 to vector<32x128xf32>
    %201 = arith.mulf %200, %199 : vector<32x128xf32>
    %202 = math.tanh %201 : vector<32x128xf32>
    %cst_76 = arith.constant 1.000000e+00 : f32
    %203 = vector.broadcast %cst_76 : f32 to vector<32x128xf32>
    %204 = arith.addf %203, %202 : vector<32x128xf32>
    %205 = arith.mulf %194, %204 : vector<32x128xf32>
    %206 = arith.truncf %205 : vector<32x128xf32> to vector<32x128xbf16>
    %c0_77 = arith.constant 0 : index
    %c0_78 = arith.constant 0 : index
    %c0_79 = arith.constant 0 : index
    %207 = vector.load %arg18[%c0_77, %c0_78, %c0_79] : memref<1x128x32xbf16, #tpu.memory_space<vmem>>, vector<1x128x32xbf16>
    %208 = vector.shape_cast %207 : vector<1x128x32xbf16> to vector<128x32xbf16>
    %cst_80 = arith.constant dense<0.000000e+00> : vector<32x32xf32>
    %209 = tpu.matmul %206, %208, %cst_80 {dimension_numbers = #tpu.dot_dimension_numbers<[1], [0], [0], [1], [0, 0, 1, 1], [], []>} : vector<32x128xbf16>, vector<128x32xbf16>, vector<32x32xf32> -> vector<32x32xf32>
    %c0_81 = arith.constant 0 : index
    %c0_82 = arith.constant 0 : index
    %c0_83 = arith.constant 0 : index
    %210 = vector.load %arg19[%c0_81, %c0_82, %c0_83] : memref<1x1x32xf32, #tpu.memory_space<vmem>>, vector<1x1x32xf32>
    %211 = vector.shape_cast %210 : vector<1x1x32xf32> to vector<1x32xf32>
    %212 = vector.broadcast %211 : vector<1x32xf32> to vector<32x32xf32>
    %213 = arith.addf %209, %212 : vector<32x32xf32>
    %214 = arith.addf %158, %213 : vector<32x32xf32>
    %c0_84 = arith.constant 0 : index
    %c0_85 = arith.constant 0 : index
    %215 = vector.load %arg21[%c0_84, %c0_85] : memref<32x32xf32, #tpu.memory_space<vmem>>, vector<32x32xf32>
    tpu.vector_store %arg21[%c0_84, %c0_85], %214 {strides = array<i32>} : memref<32x32xf32, #tpu.memory_space<vmem>>, vector<32x32xf32>,
    %c1_i32 = arith.constant 1 : i32
    %216 = arith.cmpi eq, %arg1, %c1_i32 : i32
    %217 = arith.extui %216 : i1 to i32
    %c0_i32_86 = arith.constant 0 : i32
    %218 = arith.cmpi ne, %217, %c0_i32_86 : i32
    scf.if %218 {
      %c0_87 = arith.constant 0 : index
      %c0_88 = arith.constant 0 : index
      %219 = vector.load %arg6[%c0_87, %c0_88] : memref<1x32xf32, #tpu.memory_space<vmem>>, vector<1x32xf32>
      %c0_89 = arith.constant 0 : index
      %c0_90 = arith.constant 0 : index
      %220 = vector.load %arg7[%c0_89, %c0_90] : memref<1x32xf32, #tpu.memory_space<vmem>>, vector<1x32xf32>
      %cst_91 = arith.constant dense<0.000000e+00> : vector<32xf32>
      %221 = vector.multi_reduction <add>, %214, %cst_91 [1] : vector<32x32xf32> to vector<32xf32>
      %222 = vector.shape_cast %221 : vector<32xf32> to vector<32x1xf32>
      %cst_92 = arith.constant 3.200000e+01 : f32
      %223 = vector.broadcast %cst_92 : f32 to vector<32x1xf32>
      %224 = arith.divf %222, %223 : vector<32x1xf32>
      %225 = vector.broadcast %224 : vector<32x1xf32> to vector<32x32xf32>
      %226 = arith.subf %214, %225 : vector<32x32xf32>
      %227 = arith.mulf %226, %226 : vector<32x32xf32>
      %cst_93 = arith.constant dense<0.000000e+00> : vector<32xf32>
      %228 = vector.multi_reduction <add>, %227, %cst_93 [1] : vector<32x32xf32> to vector<32xf32>
      %229 = vector.shape_cast %228 : vector<32xf32> to vector<32x1xf32>
      %cst_94 = arith.constant 3.200000e+01 : f32
      %230 = vector.broadcast %cst_94 : f32 to vector<32x1xf32>
      %231 = arith.divf %229, %230 : vector<32x1xf32>
      %232 = vector.broadcast %224 : vector<32x1xf32> to vector<32x32xf32>
      %233 = arith.subf %214, %232 : vector<32x32xf32>
      %cst_95 = arith.constant 9.99999974E-6 : f32
      %234 = vector.broadcast %cst_95 : f32 to vector<32x1xf32>
      %235 = arith.addf %231, %234 : vector<32x1xf32>
      %236 = math.rsqrt %235 : vector<32x1xf32>
      %237 = vector.broadcast %236 : vector<32x1xf32> to vector<32x32xf32>
      %238 = arith.mulf %233, %237 : vector<32x32xf32>
      %239 = vector.broadcast %219 : vector<1x32xf32> to vector<32x32xf32>
      %240 = arith.mulf %238, %239 : vector<32x32xf32>
      %241 = vector.broadcast %220 : vector<1x32xf32> to vector<32x32xf32>
      %242 = arith.addf %240, %241 : vector<32x32xf32>
      %243 = vector.shape_cast %242 : vector<32x32xf32> to vector<2x16x32xf32>
      %244 = arith.truncf %243 : vector<2x16x32xf32> to vector<2x16x32xbf16>
      %c0_96 = arith.constant 0 : index
      %c0_97 = arith.constant 0 : index
      %c0_98 = arith.constant 0 : index
      %245 = vector.load %arg20[%c0_96, %c0_97, %c0_98] : memref<2x16x32xbf16, #tpu.memory_space<vmem>>, vector<2x16x32xbf16>
      tpu.vector_store %arg20[%c0_96, %c0_97, %c0_98], %244 {strides = array<i32>} : memref<2x16x32xbf16, #tpu.memory_space<vmem>>, vector<2x16x32xbf16>,
    } else {
    }
    return
  }
  func.func @transform_0(%arg0: i32, %arg1: i32) -> (i32, i32, i32) {
    %c0_i32 = arith.constant 0 : i32
    %c0_i32_0 = arith.constant 0 : i32
    %c0_i32_1 = arith.constant 0 : i32
    return %arg0, %c0_i32, %c0_i32_0 : i32, i32, i32
  }
  func.func @transform_1(%arg0: i32, %arg1: i32) -> (i32, i32) {
    %c0_i32 = arith.constant 0 : i32
    %c0_i32_0 = arith.constant 0 : i32
    %c0_i32_1 = arith.constant 0 : i32
    return %c0_i32, %c0_i32_0 : i32, i32
  }
  func.func @transform_2(%arg0: i32, %arg1: i32) -> (i32, i32) {
    %c0_i32 = arith.constant 0 : i32
    %c0_i32_0 = arith.constant 0 : i32
    %c0_i32_1 = arith.constant 0 : i32
    return %c0_i32, %c0_i32_0 : i32, i32
  }
  func.func @transform_3(%arg0: i32, %arg1: i32) -> (i32, i32) {
    %c0_i32 = arith.constant 0 : i32
    %c0_i32_0 = arith.constant 0 : i32
    %c0_i32_1 = arith.constant 0 : i32
    return %c0_i32, %c0_i32_0 : i32, i32
  }
  func.func @transform_4(%arg0: i32, %arg1: i32) -> (i32, i32) {
    %c0_i32 = arith.constant 0 : i32
    %c0_i32_0 = arith.constant 0 : i32
    %c0_i32_1 = arith.constant 0 : i32
    return %c0_i32, %c0_i32_0 : i32, i32
  }
  func.func @transform_5(%arg0: i32, %arg1: i32) -> (i32, i32) {
    %c0_i32 = arith.constant 0 : i32
    %c0_i32_0 = arith.constant 0 : i32
    %c0_i32_1 = arith.constant 0 : i32
    return %c0_i32, %c0_i32_0 : i32, i32
  }
  func.func @transform_6(%arg0: i32, %arg1: i32) -> (i32, i32, i32) {
    %c0_i32 = arith.constant 0 : i32
    %c0_i32_0 = arith.constant 0 : i32
    %c0_i32_1 = arith.constant 0 : i32
    return %arg1, %c0_i32, %c0_i32_0 : i32, i32, i32
  }
  func.func @transform_7(%arg0: i32, %arg1: i32) -> (i32, i32, i32) {
    %c0_i32 = arith.constant 0 : i32
    %c0_i32_0 = arith.constant 0 : i32
    %c0_i32_1 = arith.constant 0 : i32
    return %arg1, %c0_i32, %c0_i32_0 : i32, i32, i32
  }
  func.func @transform_8(%arg0: i32, %arg1: i32) -> (i32, i32, i32) {
    %c0_i32 = arith.constant 0 : i32
    %c0_i32_0 = arith.constant 0 : i32
    %c0_i32_1 = arith.constant 0 : i32
    return %arg1, %c0_i32, %c0_i32_0 : i32, i32, i32
  }
  func.func @transform_9(%arg0: i32, %arg1: i32) -> (i32, i32, i32) {
    %c0_i32 = arith.constant 0 : i32
    %c0_i32_0 = arith.constant 0 : i32
    %c0_i32_1 = arith.constant 0 : i32
    return %arg1, %c0_i32, %c0_i32_0 : i32, i32, i32
  }
  func.func @transform_10(%arg0: i32, %arg1: i32) -> (i32, i32, i32) {
    %c0_i32 = arith.constant 0 : i32
    %c0_i32_0 = arith.constant 0 : i32
    %c0_i32_1 = arith.constant 0 : i32
    return %arg1, %c0_i32, %c0_i32_0 : i32, i32, i32
  }
  func.func @transform_11(%arg0: i32, %arg1: i32) -> (i32, i32, i32) {
    %c0_i32 = arith.constant 0 : i32
    %c0_i32_0 = arith.constant 0 : i32
    %c0_i32_1 = arith.constant 0 : i32
    return %arg1, %c0_i32, %c0_i32_0 : i32, i32, i32
  }
  func.func @transform_12(%arg0: i32, %arg1: i32) -> (i32, i32, i32) {
    %c0_i32 = arith.constant 0 : i32
    %c0_i32_0 = arith.constant 0 : i32
    %c0_i32_1 = arith.constant 0 : i32
    return %arg1, %c0_i32, %c0_i32_0 : i32, i32, i32
  }
  func.func @transform_13(%arg0: i32, %arg1: i32) -> (i32, i32, i32) {
    %c0_i32 = arith.constant 0 : i32
    %c0_i32_0 = arith.constant 0 : i32
    %c0_i32_1 = arith.constant 0 : i32
    return %arg1, %c0_i32, %c0_i32_0 : i32, i32, i32
  }
  func.func @transform_14(%arg0: i32, %arg1: i32) -> (i32, i32, i32) {
    %c0_i32 = arith.constant 0 : i32
    %c0_i32_0 = arith.constant 0 : i32
    %c0_i32_1 = arith.constant 0 : i32
    return %arg1, %c0_i32, %c0_i32_0 : i32, i32, i32
  }
  func.func @transform_15(%arg0: i32, %arg1: i32) -> (i32, i32, i32) {
    %c0_i32 = arith.constant 0 : i32
    %c0_i32_0 = arith.constant 0 : i32
    %c0_i32_1 = arith.constant 0 : i32
    return %arg1, %c0_i32, %c0_i32_0 : i32, i32, i32
  }
  func.func @transform_16(%arg0: i32, %arg1: i32) -> (i32, i32, i32) {
    %c0_i32 = arith.constant 0 : i32
    %c0_i32_0 = arith.constant 0 : i32
    %c0_i32_1 = arith.constant 0 : i32
    return %arg1, %c0_i32, %c0_i32_0 : i32, i32, i32
  }
  func.func @transform_17(%arg0: i32, %arg1: i32) -> (i32, i32, i32) {
    %c0_i32 = arith.constant 0 : i32
    %c0_i32_0 = arith.constant 0 : i32
    %c0_i32_1 = arith.constant 0 : i32
    return %arg1, %c0_i32, %c0_i32_0 : i32, i32, i32
  }
  func.func @transform_18(%arg0: i32, %arg1: i32) -> (i32, i32, i32) {
    %c0_i32 = arith.constant 0 : i32
    %c0_i32_0 = arith.constant 0 : i32
    %c0_i32_1 = arith.constant 0 : i32
    return %arg0, %c0_i32, %c0_i32_0 : i32, i32, i32
  }
}

</mosaic_0001>

<bundles_post_ra>
// kernel: tpu_custom_call.1
= control target key start
LH: loop header
LB: loop body
LE: loop exit
PB: predicated region body
PF: predicated region fallthrough
CT: control target
= control target key end

     0   :  { %s4011_s0 = inlined_call_operand.vmem [shape: bf16[4,16,8], index: 0, kind: input, shape index: {}]   ;;  %s4012_s1 = inlined_call_operand.vmem [shape: f32[16,32], index: 1, kind: input, shape index: {}]   ;;  %s4013_s2 = inlined_call_operand.vmem [shape: bf16[8,32], index: 2, kind: input, shape index: {}]   ;;  %s4014_s3 = inlined_call_operand.vmem [shape: f32[1,32], index: 3, kind: input, shape index: {}]   ;;  %s4015_s4 = inlined_call_operand.vmem [shape: f32[1,32], index: 4, kind: input, shape index: {}]   ;;  %s4016_s5 = inlined_call_operand.vmem [shape: f32[1,32], index: 5, kind: input, shape index: {}]   ;;  %s4017_s6 = inlined_call_operand.vmem [shape: f32[2,1,32], index: 6, kind: input, shape index: {}]   ;;  %s4018_s7 = inlined_call_operand.vmem [shape: f32[2,1,32], index: 7, kind: input, shape index: {}]   ;;  %s4019_s8 = inlined_call_operand.vmem [shape: bf16[2,32,96], index: 8, kind: input, shape index: {}]   ;;  %s4020_s9 = inlined_call_operand.vmem [shape: f32[2,1,96], index: 9, kind: input, shape index: {}]   ;;  %s4021_s10 = inlined_call_operand.vmem [shape: bf16[2,32,32], index: 10, kind: input, shape index: {}]   ;;  %s4022_s11 = inlined_call_operand.vmem [shape: f32[2,1,32], index: 11, kind: input, shape index: {}]   ;;  %s4023_s12 = inlined_call_operand.vmem [shape: f32[2,1,32], index: 12, kind: input, shape index: {}]   ;;  %s4024_s13 = inlined_call_operand.vmem [shape: f32[2,1,32], index: 13, kind: input, shape index: {}]   ;;  %s4025_s14 = inlined_call_operand.vmem [shape: bf16[2,32,128], index: 14, kind: input, shape index: {}]   ;;  %s4026_s15 = inlined_call_operand.vmem [shape: f32[2,1,128], index: 15, kind: input, shape index: {}]   ;;  %s4027_s16 = inlined_call_operand.vmem [shape: bf16[2,128,32], index: 16, kind: input, shape index: {}]   ;;  %s4028_s17 = inlined_call_operand.vmem [shape: f32[2,1,32], index: 17, kind: input, shape index: {}]   ;;  %s4029_s18 = inlined_call_operand.hbm [shape: bf16[4,16,32], index: 18, kind: output, shape index: {}]  }
   0x1   :  { %4046 = sst [smem:[#allocation20_spill]] %s4011_s0 }
   0x2   :  { %4047 = sst [smem:[#allocation21_spill]] %s4012_s1 }
   0x3   :  { %4048 = sst [smem:[#allocation22_spill]] %s4013_s2 }
   0x4   :  { %4049 = sst [smem:[#allocation23_spill]] %s4014_s3 }
   0x5   :  { %4050 = sst [smem:[#allocation24_spill]] %s4015_s4 }
   0x6   :  { %4051 = sst [smem:[#allocation25_spill]] %s4016_s5 }
   0x7   :  { %4052 = sst [smem:[#allocation26_spill]] %s4019_s8 }
   0x8   :  { %4053 = sst [smem:[#allocation27_spill]] %s4021_s10 }
   0x9   :  { %4054 = sst [smem:[#allocation28_spill]] %s4023_s12 }
   0xa   :  { %4055 = sst [smem:[#allocation29_spill]] %s4027_s16 }
   0xb   :  { %4056 = sst [smem:[#allocation30_spill]] %s4029_s18 }
   0xc   :  { %23 = vsyncpa [#allocation5], 0 }
   0xd   :  { %25 = vsyncpa [#allocation5 + $0x1], 0  ;;  %s3493_s27 = smov 0   ;;  %s3495_s28 = smov 0  }
   0xe   :  { %s3497_s29 = smov 0   ;;  %s3499_s30 = smov 0  }
   0xf   :  { %s3501_s0 = smov 0   ;;  %s3503_s19 = smov 0  }
  0x10   :  { %s3505_s1 = smov 0   ;;  %s3507_s20 = smov 0  }
  0x11 LB: > { %4057 = sst [smem:[#allocation7_spill]] %s3349_s27  ;;  %s2783_s21 = sadd.s32 4294967295, %s3377_s20   ;;  %s3377_s20 = sphi %s3507_s20, %s31_s20   ;;  %s3373_s1 = sphi %s3505_s1, %s4105_s1   ;;  %s3369_s19 = sphi %s3503_s19, %s4104_s19   ;;  %s3365_s0 = sphi %s3501_s0, %s4103_s0   ;;  %s3361_s30 = sphi %s3499_s30, %s4102_s30   ;;  %s3357_s29 = sphi %s3497_s29, %s4101_s29   ;;  %s3353_s28 = sphi %s3495_s28, %s4100_s28   ;;  %s3349_s27 = sphi %s3493_s27, %s4099_s27  }
  0x12   : > { %4058 = sst [smem:[#allocation8_spill]] %s3353_s28  ;;  %s2784_s22 = sadd.s32 4294967294, %s3377_s20  }
  0x13   : > { %4059 = sst [smem:[#allocation9_spill]] %s3357_s29  ;;  %s40_s2 = sadd.s32 1, %s3369_s19 }
  0x14   : > { %4060 = sst [smem:[#allocation10_spill]] %s3361_s30  ;;  %p41_p0 = scmp.ge.s32.totalorder %s40_s2, 2 }
  0x15   : > { %4061 = sst [smem:[#allocation11_spill]] %s3365_s0  ;;  %s43_s23 = sadd.s32 1, %s3373_s1 }
  0x16   : > { %4062 = sst [smem:[#allocation12_spill]] %s3369_s19  ;;  %p503_p1 = scmp.ne.s32.totalorder %s3357_s29, %s3353_s28 }
  0x17   : > { %4063 = sst [smem:[#allocation13_spill]] %s3373_s1  ;;  %p504_p2 = scmp.eq.s32.totalorder %s2783_s21, 3 }
  0x18   : > { %4064 = sst [smem:[#allocation14_spill]] %s3377_s20  ;;  %s4107_s2 = smov (%p41_p0, %s40_s2), 0 }
  0x19   : > { %4065 = sst [smem:[#allocation15_spill]] %s4107_s2  ;;  %s4109_s23 = smov (!%p41_p0, %s43_s23), %s3373_s1 }
  0x1a   : > { %p3542_p3 = por %p504_p2, %p503_p1  ;;  %p509_p4 = scmp.ne.s32.totalorder %s3353_s28, %s3349_s27 }
  0x1b   : > { %p45_p5 = scmp.ge.s32.totalorder %s4109_s23, 2  ;;  %p510_p6 = scmp.eq.s32.totalorder %s2784_s22, 3 }
  0x1c   : > { %s4066_s24 = scalar_select %p3542_p3, 1, 0 }
  0x1d   : > { %p2787_p7 = scmp.ge.s32.totalorder %s3377_s20, 1  ;;  %p633_p8 = scmp.lt.s32.totalorder %s3377_s20, 5 }
  0x1e   : > { %4067 = sst [smem:[#allocation16_spill]] %s4066_s24  ;;  %s4111_s23 = smov (%p45_p5, %s4109_s23), 0 }
  0x1f   : > { %4068 = sst [smem:[#allocation17_spill]] %s4111_s23  ;;  %p3552_p9 = por %p510_p6, %p509_p4 }
  0x20   : > { %p634_p10 = pnand %p2787_p7, %p633_p8  ;;  %s490_s26 = ssub.s32 %s3373_s1, %s4111_s23 }
  0x21   : > { %s4069_s25 = scalar_select %p3552_p9, 1, 0 }
  0x22   : > { %s493_s21 = sadd.s32 1, %s3357_s29  ;;  %p491_p11 = scmp.eq.s32.totalorder %s490_s26, 0 }
  0x23   : > { %4070 = sst [smem:[#allocation18_spill]] %s4069_s25  ;;  %637 = sbr.rel (%p634_p10) target bundleno = 4906 (0x132a), region = 92 }
  0x24   : > { %s3560_s2 = scalar_select %p491_p11, %s3357_s29, %s493_s21  }
  0x25   : > { %s4036_s22 = sand.u32 (!%p634_p10), 1, %s3353_s28   ;;  %s2789_s19 = sshll.u32 (!%p634_p10), %s3365_s0, 1 }
  0x26   : > { %4071 = sst [smem:[#allocation19_spill]] %s3560_s2  ;;  %s2788_s27 = sshll.u32 (!%p634_p10), %s4036_s22, 4 }
  0x27   : > { %p733_p12 = scmp.lt.s32.totalorder (!%p634_p10), %s2789_s19, 3  ;;  %p739_p13 = scmp.lt.s32.totalorder (!%p634_p10), %s3361_s30, 1 }
  0x28   : > { %s4072_s1 = sld [smem:[#allocation20_spill]] (!%p634_p10)  ;;  %s4073_s8 = sld [smem:[#allocation26_spill]] (!%p634_p10) }
  0x29   : > { %s4074_s10 = sld [smem:[#allocation27_spill]] (!%p634_p10)  ;;  %s4076_s28 = sld [smem:[#allocation29_spill]] (!%p634_p10) }
  0x2a   : > { %s4113_s19 = smov (!%p733_p12, %s2789_s19), 3  ;;  %s3627_s4 = scalar_lea.vmem [#allocation4], %s2788_s27 }
  0x2b   : > { %s3568_s25 = scalar_select %p739_p13, %s3361_s30, 1 }
  0x2c   : > { %s2863_s26 = sshll.u32 %s4113_s19, 3  ;;  %s4077_s5 = sld [smem:[#allocation10_spill]] }
  0x2d   : > { %s2864_s0 = sshll.u32 %s3568_s25, 4  ;;  %s766_s20 = scalar_lea.vmem %s4024_s13, %s3568_s25 }
  0x2e   : > { %s737_s22 = scalar_lea.vmem %s4072_s1, %s2863_s26  ;;  %s3585_s3 = scalar_lea.vmem %s4073_s8, %s2864_s0 }
  0x2f   : > { %s3594_s26 = scalar_lea.vmem %s4074_s10, %s2864_s0  ;;  %s3611_s19 = scalar_lea.vmem %s4025_s14, %s2864_s0 }
  0x30   : > { %s774_s16 = scalar_lea.vmem %s4026_s15, %s3568_s25  ;;  %s2867_s10 = sshll.u32 %s3568_s25, 6 }
  0x31   : > { %s782_s18 = scalar_lea.vmem %s4028_s17, %s3568_s25  ;;  %s3625_s12 = scalar_lea.vmem %s4076_s28, %s2867_s10 }
  0x32   : > { %p2800_p0 = scmp.ne.s32.totalorder %s4077_s5, 0 }
  0x33   : > { %s4078_s30 = sld [smem:[#allocation22_spill]] (!%p2800_p0)  ;;  %vm818_vm0 = vcmask (!%p2800_p0), 1043456   ;;  %v3167_v1 = vld [vmem:[%s737_s22] sm:$0xff] (!%p2800_p0)   ;;  %vm811_vm1 = vcmask (!%p2800_p0), 64512   ;;  %v3168_v3 = vld [vmem:[%s737_s22 + $0x8] sm:$0xff] (!%p2800_p0)   ;;  %s4079_s27 = sld [smem:[#allocation23_spill]] (!%p2800_p0) }
  0x34   : > { %788 = sbr.rel (%p2800_p0) target bundleno = 282 (0x11a), region = 96  ;;  %2933 = vmatprep.mubr.msk.bf16.mxu0 (!%p2800_p0), %vm811_vm1, %v3167_v1  ;;  %s4080_s29 = sld [smem:[#allocation21_spill]] (!%p2800_p0)  ;;  %vm877_vm2 = vcmask (!%p2800_p0), 261120  }
  0x39   : > { %v793_v0 = vld [vmem:[%s4078_s30] sm:$0xf] (!%p2800_p0) }
  0x3a   : > { %3077 = vmatprep.subr.msk.bf16.mxu0 (!%p2800_p0), %vm818_vm0, %v793_v0  ;;  %v820_v2 = vsel (!%p2800_p0), %vm818_vm0, %v793_v0, 0  ;;  %v2801_v4 = vld [vmem:[%s4079_s27] ss:$0 sm:$0xff] (!%p2800_p0)  ;;  %s4081_s2 = smov (!%p2800_p0), %s4080_s29 }
  0x3b   : > { %2932 = vmatpush3.bf16.msra.mxu0 %v820_v2  ;;  %v871_v6 = vld [vmem:[%s4080_s29] sm:$0xff]  ;;  %v872_v11 = vld [vmem:[%s4081_s2 + $0x8] sm:$0xff] }
  0x3e   : > { %2934 = vmatmul.mubr.msk.bf16.vlgmr.msra.gmra.mrb[0].mxu0 %vm811_vm1, %v3168_v3 }
 0x111   : > { %v2935_v5 = vpop.f32.mrb[0].mxu0 }
 0x112   : > { %v865_v7 = vadd.f32 %v2935_v5, %v2801_v4  ;;  %v856_v8 = vpop.f32.mrb[1].mxu0 }
 0x113   : > { %v857_v9 = vadd.f32 %v2801_v4, %v856_v8  ;;  %v2936_v10 = vpop.f32.mrb[2].mxu0 }
 0x114   : > { %v875_v12 = vadd.f32 %v871_v6, %v865_v7  ;;  %v868_v13 = vadd.f32 %v2936_v10, %v2801_v4  ;;  %v859_v14 = vpop.f32.mrb[3].mxu0 }
 0x115   : > { %v873_v15 = vadd.f32 %v871_v6, %v857_v9  ;;  %v860_v16 = vadd.f32 %v2801_v4, %v859_v14 }
 0x116   : > { %880 = vst.msk [vmem:[#allocation2 + $0x10] sm:$0xff] %vm877_vm2, %v875_v12  ;;  %v876_v17 = vadd.f32 %v872_v11, %v868_v13 }
 0x117   : > { %878 = vst.msk [vmem:[#allocation2] sm:$0xff] %vm877_vm2, %v873_v15  ;;  %v874_v18 = vadd.f32 %v872_v11, %v860_v16 }
 0x118   : > { %881 = vst.msk [vmem:[#allocation2 + $0x18] sm:$0xff] %vm877_vm2, %v876_v17 }
 0x119   : > { %879 = vst.msk [vmem:[#allocation2 + $0x8] sm:$0xff] %vm877_vm2, %v874_v18 }
 0x11a PF: > { %vm897_vm3 = vcmask 261120   ;;  %v3169_v47 = vld [vmem:[%s3585_s3] sm:$0xff]   ;;  %v3170_v48 = vld [vmem:[%s3585_s3 + $0x8] sm:$0xff]   ;;  %s4082_s5 = scalar_lea.vmem %s4017_s6, %s3568_s25  ;;  %s4083_s30 = scalar_lea.vmem %s4018_s7, %s3568_s25  ;;  %v3379_v17 = vmov 0.0   ;;  %vm3380_vm4 = vmmov 0   ;;  %vm1062_vm5 = vcmask 64512  }
 0x11b   : > { %2937 = vmatprep.subr.bf16.mxu0 %v3169_v47  ;;  %v2806_v63 = vld [vmem:[%s4082_s5] ss:$0 sm:$0xff]  ;;  %2957 = vmatprep.subr.bf16.mxu1 %v3379_v17  ;;  %s4084_s27 = scalar_lea.vmem %s4020_s9, %s3568_s25  ;;  %s3381_s23 = smov 96   ;;  %vm1160_vm8 = vcmask 130048   ;;  %vm1559_vm9 = vcmask 130112   ;;  %vm1814_vm10 = vcmask 195712  }
 0x11c   : > { %2938 = vmatpush3.bf16.msra.mxu0 %v3169_v47  ;;  %v2807_v5 = vld [vmem:[%s4083_s30] ss:$0 sm:$0xff]  ;;  %2959 = vmatprep.mubr.msk.bf16.mxu1 %vm3380_vm4, %v3379_v17  ;;  %s3383_s1 = smov 64   ;;  %s3384_s29 = smov 88   ;;  %vm2069_vm11 = vcmask 261312  }
 0x11d   : > { %v884_v20 = vld [vmem:[#allocation2 + $0x10] sm:$0xff]  ;;  %2939 = vmatprep.subr.bf16.mxu0 %v3170_v48  ;;  %v2808_v18 = vld [vmem:[%s4084_s27] ss:$0 sm:$0xff]  ;;  %s3385_s24 = smov 120   ;;  %s3386_s21 = smov 56  }
 0x11e   : > { %v882_v19 = vld [vmem:[#allocation2] sm:$0xff]  ;;  %v904_v23 = vsel %vm897_vm3, %v884_v20, 0.0  ;;  %s3387_s3 = smov 80   ;;  %s3388_s22 = smov 112  }
 0x11f   : > { %v898_v22 = vsel %vm897_vm3, %v882_v19, 0.0  ;;  %v885_v24 = vld [vmem:[#allocation2 + $0x18] sm:$0xff]  ;;  %905 = vadd.xlane.f32.xlu1 %v904_v23  ;;  %s3389_s5 = smov 48   ;;  %s3390_s8 = smov 72  }
 0x120   : > { %v883_v21 = vld [vmem:[#allocation2 + $0x8] sm:$0xff]  ;;  %899 = vadd.xlane.f32.xlu0 %v898_v22  ;;  %v907_v26 = vsel %vm897_vm3, %v885_v24, 0.0  ;;  %2940 = vmatpush3.bf16.msra.mxu0 %v3170_v48  ;;  %s3391_s0 = smov 104   ;;  %s3392_s30 = smov 40  }
 0x121   : > { %v901_v25 = vsel %vm897_vm3, %v883_v21, 0.0  ;;  %2945 = vmatprep.subr.bf16.mxu0 %v3379_v17  ;;  %s3393_s10 = smov 8   ;;  %s3394_s28 = smov 16  }
 0x122   : > { %s3395_s27 = smov 24  }
 0x123   : > { %908 = vadd.xlane.f32.xlu1 %v907_v26 }
 0x124   : > { %902 = vadd.xlane.f32.xlu0 %v901_v25 }
 0x1ac   : > { %v906_v28 = vpop.xlane.xlu1 %905 }
 0x1ad   : > { %v900_v27 = vpop.xlane.xlu0 %899  ;;  %v913_v30 = vmul.f32 0.03125, %v906_v28 }
 0x1ae   : > { %v911_v29 = vmul.f32 0.03125, %v900_v27 }
 0x1af   : > { %v917_v32 = vsub.f32 %v884_v20, %v913_v30 }
 0x1b0   : > { %v915_v31 = vsub.f32 %v882_v19, %v911_v29  ;;  %v909_v34 = vpop.xlane.xlu1 %908 }
 0x1b1   : > { %v903_v33 = vpop.xlane.xlu0 %902  ;;  %v914_v36 = vmul.f32 0.03125, %v909_v34  ;;  %v921_v38 = vmul.f32 %v917_v32, %v917_v32 }
 0x1b2   : > { %v912_v35 = vmul.f32 0.03125, %v903_v33  ;;  %v919_v37 = vmul.f32 %v915_v31, %v915_v31 }
 0x1b3   : > { %v918_v40 = vsub.f32 %v885_v24, %v914_v36  ;;  %v929_v42 = vsel %vm897_vm3, %v921_v38, 0.0 }
 0x1b4   : > { %v916_v39 = vsub.f32 %v883_v21, %v912_v35  ;;  %v923_v41 = vsel %vm897_vm3, %v919_v37, 0.0 }
 0x1b5   : > { %924 = vadd.xlane.f32.xlu0 %v923_v41  ;;  %v922_v44 = vmul.f32 %v918_v40, %v918_v40 }
 0x1b6   : > { %v920_v43 = vmul.f32 %v916_v39, %v916_v39 }
 0x1b7   : > { %v932_v46 = vsel %vm897_vm3, %v922_v44, 0.0 }
 0x1b8   : > { %v926_v45 = vsel %vm897_vm3, %v920_v43, 0.0  ;;  %v3382_v43 = vmov -1e+30  }
 0x1b9   : > { %930 = vadd.xlane.f32.xlu0 %v929_v42  ;;  %927 = vadd.xlane.f32.xlu1 %v926_v45 }
 0x1bd   : > { %933 = vadd.xlane.f32.xlu1 %v932_v46 }
 0x242   : > { %v925_v49 = vpop.xlane.xlu0 %924 }
 0x243   : > { %v935_v50 = vmul.f32 0.03125, %v925_v49 }
 0x245   : > { %v939_v51 = vadd.f32 1e-05, %v935_v50 }
 0x246   : > { %v928_v52 = vpop.xlane.xlu1 %927  ;;  %v931_v53 = vpop.xlane.xlu0 %930 }
 0x247   : > { %3183 = vrsqrt.f32 %v939_v51  ;;  %v936_v54 = vmul.f32 0.03125, %v928_v52  ;;  %v937_v55 = vmul.f32 0.03125, %v931_v53 }
 0x249   : > { %v940_v56 = vadd.f32 1e-05, %v936_v54  ;;  %v941_v57 = vadd.f32 1e-05, %v937_v55 }
 0x24a   : > { %v934_v58 = vpop.xlane.xlu1 %933 }
 0x24b   : > { %3185 = vrsqrt.f32 %v940_v56  ;;  %v938_v59 = vmul.f32 0.03125, %v934_v58 }
 0x24c   : > { %3187 = vrsqrt.f32 %v941_v57 }
 0x24d   : > { %v942_v60 = vadd.f32 1e-05, %v938_v59 }
 0x24f   : > { %3189 = vrsqrt.f32 %v942_v60 }
 0x251   : > { %v3184_v61 = vpop.eup %3183 }
 0x252   : > { %v947_v62 = vmul.f32 %v3184_v61, %v915_v31 }
 0x254   : > { %v957_v3 = vmul.f32 %v2806_v63, %v947_v62 }
 0x255   : > { %v3186_v0 = vpop.eup %3185 }
 0x256   : > { %v3188_v1 = vpop.eup %3187  ;;  %v948_v2 = vmul.f32 %v3186_v0, %v916_v39  ;;  %v967_v9 = vadd.f32 %v2807_v5, %v957_v3  ;;  %v886_v39 = vlaneseq }
 0x257   : > { %v949_v4 = vmul.f32 %v3188_v1, %v917_v32 }
 0x258   : > { %v958_v6 = vmul.f32 %v2806_v63, %v948_v2  ;;  %v890_v41 = vand.u32 127, %v886_v39 }
 0x259   : > { %v3190_v7 = vpop.eup %3189  ;;  %v959_v11 = vmul.f32 %v2806_v63, %v949_v4 }
 0x25a   : > { %v950_v8 = vmul.f32 %v3190_v7, %v918_v40  ;;  %v968_v10 = vadd.f32 %v2807_v5, %v958_v6  ;;  %v887_v40 = vshrl.u32 %v886_v39, 7 }
 0x25b   : > { %v969_v14 = vadd.f32 %v2807_v5, %v959_v11 }
 0x25c   : > { %v971_v12 = vpack.c.bf16 %v968_v10, %v967_v9  ;;  %v960_v13 = vmul.f32 %v2806_v63, %v950_v8  ;;  %v888_v42 = vadd.s32 8, %v887_v40  ;;  %vm891_vm6 = vcmp.ge.s32.totalorder %v887_v40, %v890_v41 }
 0x25d   : > { %v3697_v44 = vsel %vm891_vm6, 0.0, %v3382_v43 }
 0x25e   : > { %2941 = vmatprep.mubr.msk.bf16.mxu0 %vm897_vm3, %v971_v12  ;;  %v970_v15 = vadd.f32 %v2807_v5, %v960_v13  ;;  %vm892_vm7 = vcmp.ge.s32.totalorder %v888_v42, %v890_v41 }
 0x25f   : > { %v3699_v46 = vsel %vm892_vm7, 0.0, %v3382_v43 }
 0x260   : > { %v972_v16 = vpack.c.bf16 %v970_v15, %v969_v14 }
 0x262   : > { %2942 = vmatmul.mubr.msk.bf16.vlgmr.msra.gmra.mrb[0].mxu0 %vm897_vm3, %v972_v16 }
 0x263   : > { %2947 = vmatprep.mubr.msk.bf16.mxu0 %vm3380_vm4, %v3379_v17 }
 0x335   : > { %v2943_v19 = vpop.f32.mrb[0].mxu0 }
 0x336   : > { %v1045_v20 = vadd.f32 %v2943_v19, %v2808_v18  ;;  %v1036_v21 = vpop.f32.mrb[1].mxu0 }
 0x337   : > { %v1037_v22 = vadd.f32 %v2808_v18, %v1036_v21  ;;  %v2944_v23 = vpop.f32.mrb[2].mxu0 }
 0x338   : > { %v1048_v24 = vadd.f32 %v2944_v23, %v2808_v18  ;;  %v1039_v25 = vpop.f32.mrb[3].mxu0  ;;  %v1053_v27 = vmul.f32 0.35355338, %v1045_v20 }
 0x339   : > { %v1040_v26 = vadd.f32 %v2808_v18, %v1039_v25  ;;  %v1051_v30 = vmul.f32 0.35355338, %v1037_v22 }
 0x33a   : > { %v1054_v28 = vmul.f32 0.35355338, %v1048_v24  ;;  %v3675_v29 = vpack.c.bf16 %v1048_v24, %v1045_v20 }
 0x33b   : > { %v1052_v31 = vmul.f32 0.35355338, %v1040_v26  ;;  %v3677_v32 = vpack.c.bf16 %v1040_v26, %v1037_v22 }
 0x33c   : > { %v3679_v33 = vpack.c.bf16 %v1054_v28, %v1053_v27  ;;  %1111 = vrot.lane.b32.xlu1 %v3675_v29, %s3381_s23 }
 0x33d   : > { %v3682_v34 = vpack.c.bf16 %v1052_v31, %v1051_v30  ;;  %1060 = vrot.lane.b32.xlu0 %v3677_v32, %s3381_s23 }
 0x3ae   : > { %v1112_v37 = vpop.permute.xlu1 %1111 }
 0x3af   : > { %v1061_v35 = vpop.permute.xlu0 %1060  ;;  %v1117_v38 = vsel %vm1062_vm5, %v1112_v37, 0 }
 0x3b0   : > { %v1067_v36 = vsel %vm1062_vm5, %v1061_v35, 0 }
 0x3b1   : > { %2946 = vmatpush3.bf16.xpose.msra.mxu0 %v1067_v36 }
 0x3b2   : > { %2951 = vmatprep.subr.bf16.mxu0 %v3379_v17 }
 0x3b8   : > { %2948 = vmatmul.mubr.msk.bf16.vlgmr.msra.gmra.mrb[4].mxu0 %vm1062_vm5, %v3682_v34 }
 0x3b9   : > { %2952 = vmatpush3.bf16.xpose.msra.mxu0 %v1117_v38  ;;  %2953 = vmatprep.mubr.msk.bf16.mxu0 %vm3380_vm4, %v3379_v17 }
 0x3ba   : > { %2963 = vmatprep.subr.bf16.mxu0 %v3379_v17 }
 0x3c0   : > { %2954 = vmatmul.mubr.msk.bf16.vlgmr.msra.gmra.mrb[8].mxu0 %vm1062_vm5, %v3679_v33 }
 0x3c1   : > { %2965 = vmatprep.mubr.msk.bf16.mxu0 %vm3380_vm4, %v3379_v17 }
 0x48b   : > { %v1103_v45 = vpop.f32.mrb[4].mxu0 }
 0x48c   : > { %v1104_v47 = vadd.f32 %v1103_v45, %v3697_v44  ;;  %v2949_v48 = vpop.f32.mrb[5].mxu0 }
 0x48d   : > { %v1106_v49 = vpop.f32.mrb[6].mxu0 }
 0x48e   : > { %v1107_v50 = vadd.f32 %v1106_v49, %v3699_v46  ;;  %v2950_v51 = vpop.f32.mrb[7].mxu0  ;;  %v1161_v52 = vsel %vm1160_vm8, %v1104_v47, -inf }
 0x48f   : > { %1162 = vmax.xlane.f32.xlu1 %v1161_v52 }
 0x490   : > { %v1164_v53 = vsel %vm1160_vm8, %v1107_v50, -inf }
 0x491   : > { %1165 = vmax.xlane.f32.xlu0 %v1164_v53 }
 0x493   : > { %v1153_v54 = vpop.f32.mrb[8].mxu0 }
 0x494   : > { %v1154_v55 = vadd.f32 %v1153_v54, %v3697_v44  ;;  %v2955_v56 = vpop.f32.mrb[9].mxu0 }
 0x495   : > { %v1156_v57 = vpop.f32.mrb[10].mxu0 }
 0x496   : > { %v1157_v58 = vadd.f32 %v1156_v57, %v3699_v46  ;;  %v2956_v59 = vpop.f32.mrb[11].mxu0  ;;  %v1167_v60 = vsel %vm1160_vm8, %v1154_v55, -inf }
 0x497   : > { %1168 = vmax.xlane.f32.xlu0 %v1167_v60 }
 0x498   : > { %v1170_v61 = vsel %vm1160_vm8, %v1157_v58, -inf }
 0x499   : > { %1171 = vmax.xlane.f32.xlu1 %v1170_v61 }
 0x51c   : > { %v1163_v62 = vpop.xlane.xlu1 %1162 }
 0x51d   : > { %v1173_v63 = vsub.f32 %v1104_v47, %v1163_v62 }
 0x51e   : > { %v1166_v0 = vpop.xlane.xlu0 %1165 }
 0x51f   : > { %v1177_v1 = vmul.f32 1.442695, %v1173_v63  ;;  %v1174_v2 = vsub.f32 %v1107_v50, %v1166_v0 }
 0x521   : > { %3191 = vpow2.f32 %v1177_v1  ;;  %v1179_v3 = vmul.f32 1.442695, %v1174_v2 }
 0x523   : > { %3193 = vpow2.f32 %v1179_v3 }
 0x524   : > { %v1169_v4 = vpop.xlane.xlu0 %1168 }
 0x525   : > { %v1175_v5 = vsub.f32 %v1154_v55, %v1169_v4 }
 0x526   : > { %v1172_v13 = vpop.xlane.xlu1 %1171 }
 0x527   : > { %v1181_v6 = vmul.f32 1.442695, %v1175_v5  ;;  %v1176_v14 = vsub.f32 %v1157_v58, %v1172_v13 }
 0x529   : > { %3195 = vpow2.f32 %v1181_v6  ;;  %v1183_v15 = vmul.f32 1.442695, %v1176_v14 }
 0x52b   : > { %v3192_v7 = vpop.eup %3191  ;;  %3197 = vpow2.f32 %v1183_v15 }
 0x52c   : > { %v1185_v8 = vsel %vm1160_vm8, %v3192_v7, 0.0 }
 0x52d   : > { %v3194_v9 = vpop.eup %3193  ;;  %1186 = vadd.xlane.f32.xlu0 %v1185_v8 }
 0x52e   : > { %v1188_v10 = vsel %vm1160_vm8, %v3194_v9, 0.0 }
 0x52f   : > { %1189 = vadd.xlane.f32.xlu1 %v1188_v10 }
 0x533   : > { %v3196_v11 = vpop.eup %3195 }
 0x534   : > { %v1191_v12 = vsel %vm1160_vm8, %v3196_v11, 0.0 }
 0x535   : > { %1192 = vadd.xlane.f32.xlu0 %v1191_v12  ;;  %v3198_v16 = vpop.eup %3197 }
 0x536   : > { %v1194_v18 = vsel %vm1160_vm8, %v3198_v16, 0.0 }
 0x540   : > { %1254 = vrot.lane.b32.xlu1 %v3675_v29, %s3383_s1 }
 0x544   : > { %1308 = vrot.lane.b32.xlu1 %v3677_v32, %s3384_s29 }
 0x54b   : > { %1207 = vrot.lane.b32.xlu0 %v3677_v32, %s3383_s1 }
 0x54f   : > { %1306 = vrot.lane.b32.xlu0 %v3682_v34, %s3385_s24 }
 0x568   : > { %1195 = vadd.xlane.f32.xlu1 %v1194_v18 }
 0x579   : > { %1360 = vrot.lane.b32.xlu1 %v3675_v29, %s3384_s29  ;;  %s4085_s29 = scalar_lea.vmem %s4022_s11, %s3568_s25 }
 0x57d   : > { %1358 = vrot.lane.b32.xlu1 %v3679_v33, %s3385_s24 }
 0x5ba   : > { %v1187_v19 = vpop.xlane.xlu0 %1186 }
 0x5bb   : > { %3199 = vrcp.f32 %v1187_v19 }
 0x5bc   : > { %v1190_v20 = vpop.xlane.xlu1 %1189 }
 0x5bd   : > { %3201 = vrcp.f32 %v1190_v20 }
 0x5c0   : > { %v1255_v21 = vpop.permute.xlu1 %1254 }
 0x5c1   : > { %2964 = vmatpush3.bf16.msra.mxu0 %v1255_v21 }
 0x5c2   : > { %v1193_v22 = vpop.xlane.xlu0 %1192  ;;  %2975 = vmatprep.subr.bf16.mxu0 %v3379_v17 }
 0x5c3   : > { %3203 = vrcp.f32 %v1193_v22 }
 0x5c4   : > { %v1309_v30 = vpop.permute.xlu1 %1308 }
 0x5c5   : > { %v3200_v23 = vpop.eup %3199  ;;  %v1314_v31 = vsel %vm1062_vm5, %v1309_v30, 0 }
 0x5c6   : > { %v1208_v24 = vpop.permute.xlu0 %1207  ;;  %v1201_v26 = vmul.f32 %v3200_v23, %v3192_v7 }
 0x5c7   : > { %v3202_v25 = vpop.eup %3201  ;;  %2958 = vmatpush3.bf16.msra.mxu1 %v1208_v24 }
 0x5c8   : > { %v1202_v27 = vmul.f32 %v3202_v25, %v3194_v9  ;;  %2969 = vmatprep.subr.bf16.mxu1 %v3379_v17 }
 0x5ca   : > { %v1205_v28 = vpack.c.bf16 %v1202_v27, %v1201_v26  ;;  %v1307_v35 = vpop.permute.xlu0 %1306 }
 0x5cc   : > { %2960 = vmatmul.mubr.msk.bf16.vlgmr.msra.gmra.mrb[0].mxu1 %vm1160_vm8, %v1205_v28 }
 0x5cd   : > { %2971 = vmatprep.mubr.msk.bf16.mxu1 %vm3380_vm4, %v3379_v17  ;;  %v3204_v37 = vpop.eup %3203 }
 0x5ce   : > { %v1203_v39 = vmul.f32 %v3204_v37, %v3196_v11 }
 0x5d0   : > { %2970 = vmatpush3.bf16.xpose.msra.mxu1 %v1314_v31 }
 0x5d1   : > { %2981 = vmatprep.subr.bf16.mxu1 %v3379_v17 }
 0x5d7   : > { %2972 = vmatmul.mubr.msk.bf16.vlgmr.msra.gmra.mrb[4].mxu1 %vm1062_vm5, %v1307_v35 }
 0x5d8   : > { %2983 = vmatprep.mubr.msk.bf16.mxu1 %vm3380_vm4, %v3379_v17 }
 0x5f5   : > { %v1196_v36 = vpop.xlane.xlu1 %1195 }
 0x5f6   : > { %3205 = vrcp.f32 %v1196_v36 }
 0x5f9   : > { %v1361_v41 = vpop.permute.xlu1 %1360 }
 0x5fa   : > { %v1366_v43 = vsel %vm1062_vm5, %v1361_v41, 0 }
 0x5fd   : > { %v1359_v45 = vpop.permute.xlu1 %1358 }
 0x600   : > { %v3206_v38 = vpop.eup %3205 }
 0x601   : > { %v1204_v40 = vmul.f32 %v3206_v38, %v3198_v16 }
 0x603   : > { %v1206_v42 = vpack.c.bf16 %v1204_v40, %v1203_v39 }
 0x605   : > { %2966 = vmatmul.mubr.msk.bf16.vlgmr.msra.gmra.mrb[12].mxu0 %vm1160_vm8, %v1206_v42 }
 0x606   : > { %2976 = vmatpush3.bf16.xpose.msra.mxu0 %v1366_v43  ;;  %2977 = vmatprep.mubr.msk.bf16.mxu0 %vm3380_vm4, %v3379_v17 }
 0x607   : > { %2987 = vmatprep.subr.bf16.mxu0 %v3379_v17 }
 0x60d   : > { %2978 = vmatmul.mubr.msk.bf16.vlgmr.msra.gmra.mrb[16].mxu0 %vm1062_vm5, %v1359_v45 }
 0x60e   : > { %2989 = vmatprep.mubr.msk.bf16.mxu0 %vm3380_vm4, %v3379_v17 }
 0x69f   : > { %v1247_v47 = vpop.f32.mrb[0].mxu1 }
 0x6a0   : > { %v2961_v48 = vpop.f32.mrb[1].mxu1 }
 0x6a1   : > { %v1250_v49 = vpop.f32.mrb[2].mxu1 }
 0x6a2   : > { %v1301_v50 = vpack.c.bf16 %v1250_v49, %v1247_v47  ;;  %v2962_v51 = vpop.f32.mrb[3].mxu1 }
 0x6a4   : > { %1303 = vst.msk [vmem:[#allocation3] sm:$0xff] %vm1062_vm5, %v1301_v50 }
 0x6aa   : > { %v1350_v52 = vpop.f32.mrb[4].mxu1 }
 0x6ab   : > { %v1351_v53 = vadd.f32 %v1350_v52, %v3697_v44  ;;  %v2973_v54 = vpop.f32.mrb[5].mxu1 }
 0x6ac   : > { %v1353_v55 = vpop.f32.mrb[6].mxu1 }
 0x6ad   : > { %v1354_v56 = vadd.f32 %v1353_v55, %v3699_v46  ;;  %v2974_v57 = vpop.f32.mrb[7].mxu1  ;;  %v1409_v58 = vsel %vm1160_vm8, %v1351_v53, -inf }
 0x6ae   : > { %1410 = vmax.xlane.f32.xlu0 %v1409_v58 }
 0x6af   : > { %v1412_v59 = vsel %vm1160_vm8, %v1354_v56, -inf }
 0x6b0   : > { %1413 = vmax.xlane.f32.xlu1 %v1412_v59 }
 0x6d8   : > { %v1294_v60 = vpop.f32.mrb[12].mxu0 }
 0x6d9   : > { %v2967_v61 = vpop.f32.mrb[13].mxu0 }
 0x6da   : > { %v1297_v62 = vpop.f32.mrb[14].mxu0 }
 0x6db   : > { %v1302_v63 = vpack.c.bf16 %v1297_v62, %v1294_v60  ;;  %v2968_v0 = vpop.f32.mrb[15].mxu0 }
 0x6dd   : > { %1304 = vst.msk [vmem:[#allocation3 + $0x8] sm:$0xff] %vm1062_vm5, %v1302_v63 }
 0x6e0   : > { %v1402_v1 = vpop.f32.mrb[16].mxu0 }
 0x6e1   : > { %v1403_v2 = vadd.f32 %v1402_v1, %v3697_v44  ;;  %v2979_v3 = vpop.f32.mrb[17].mxu0 }
 0x6e2   : > { %v1405_v4 = vpop.f32.mrb[18].mxu0 }
 0x6e3   : > { %v1406_v5 = vadd.f32 %v1405_v4, %v3699_v46  ;;  %v2980_v6 = vpop.f32.mrb[19].mxu0  ;;  %v1415_v7 = vsel %vm1160_vm8, %v1403_v2, -inf }
 0x6e4   : > { %1416 = vmax.xlane.f32.xlu0 %v1415_v7 }
 0x6e5   : > { %v1418_v8 = vsel %vm1160_vm8, %v1406_v5, -inf }
 0x6e8   : > { %1419 = vmax.xlane.f32.xlu0 %v1418_v8 }
 0x73b   : > { %v1411_v9 = vpop.xlane.xlu0 %1410 }
 0x73c   : > { %v1421_v10 = vsub.f32 %v1351_v53, %v1411_v9 }
 0x73d   : > { %v1414_v11 = vpop.xlane.xlu1 %1413 }
 0x73e   : > { %v1425_v12 = vmul.f32 1.442695, %v1421_v10  ;;  %v1422_v13 = vsub.f32 %v1354_v56, %v1414_v11 }
 0x740   : > { %3207 = vpow2.f32 %v1425_v12  ;;  %v1427_v14 = vmul.f32 1.442695, %v1422_v13 }
 0x742   : > { %3209 = vpow2.f32 %v1427_v14 }
 0x74a   : > { %v3208_v15 = vpop.eup %3207 }
 0x74b   : > { %v1433_v16 = vsel %vm1160_vm8, %v3208_v15, 0.0 }
 0x74c   : > { %v3210_v18 = vpop.eup %3209  ;;  %1434 = vadd.xlane.f32.xlu0 %v1433_v16 }
 0x74d   : > { %v1436_v19 = vsel %vm1160_vm8, %v3210_v18, 0.0 }
 0x74e   : > { %1437 = vadd.xlane.f32.xlu1 %v1436_v19 }
 0x75f   : > { %1502 = vrot.lane.b32.xlu1 %v3675_v29, %s3386_s21 }
 0x763   : > { %1564 = vrot.lane.b32.xlu1 %v3677_v32, %s3387_s3 }
 0x771   : > { %v1417_v20 = vpop.xlane.xlu0 %1416 }
 0x772   : > { %v1423_v21 = vsub.f32 %v1403_v2, %v1417_v20 }
 0x774   : > { %v1429_v22 = vmul.f32 1.442695, %v1423_v21 }
 0x775   : > { %v1420_v23 = vpop.xlane.xlu0 %1419 }
 0x776   : > { %3211 = vpow2.f32 %v1429_v22  ;;  %v1424_v24 = vsub.f32 %v1406_v5, %v1420_v23 }
 0x778   : > { %v1431_v25 = vmul.f32 1.442695, %v1424_v24 }
 0x77a   : > { %3213 = vpow2.f32 %v1431_v25 }
 0x780   : > { %v3212_v26 = vpop.eup %3211 }
 0x781   : > { %v1439_v27 = vsel %vm1160_vm8, %v3212_v26, 0.0 }
 0x782   : > { %1440 = vadd.xlane.f32.xlu0 %v1439_v27 }
 0x784   : > { %v3214_v28 = vpop.eup %3213 }
 0x785   : > { %v1442_v30 = vsel %vm1160_vm8, %v3214_v28, 0.0 }
 0x787   : > { %1443 = vadd.xlane.f32.xlu1 %v1442_v30 }
 0x798   : > { %1455 = vrot.lane.b32.xlu0 %v3677_v32, %s3386_s21  ;;  %1615 = vrot.lane.b32.xlu1 %v3675_v29, %s3387_s3  ;;  %s4086_s21 = sld [smem:[#allocation28_spill]] }
 0x79c   : > { %1562 = vrot.lane.b32.xlu0 %v3682_v34, %s3388_s22  ;;  %1613 = vrot.lane.b32.xlu1 %v3679_v33, %s3388_s22 }
 0x79e   : > { %s4087_s3 = scalar_lea.vmem %s4086_s21, %s3568_s25  ;;  %s4088_s25 = sld [smem:[#allocation10_spill]] }
 0x7a4   : > { %p2850_p1 = scmp.ne.s32.totalorder %s4088_s25, 1 }
 0x7a5   : > { %vm2570_vm12 = vcmask (!%p2850_p1), 257024  }
 0x7d9   : > { %v1435_v36 = vpop.xlane.xlu0 %1434 }
 0x7db   : > { %v1438_v31 = vpop.xlane.xlu1 %1437 }
 0x7dc   : > { %3215 = vrcp.f32 %v1438_v31 }
 0x7dd   : > { %3217 = vrcp.f32 %v1435_v36 }
 0x7df   : > { %v1503_v35 = vpop.permute.xlu1 %1502 }
 0x7e0   : > { %2988 = vmatpush3.bf16.msra.mxu0 %v1503_v35 }
 0x7e1   : > { %2999 = vmatprep.subr.bf16.mxu0 %v3379_v17 }
 0x7e3   : > { %v1565_v40 = vpop.permute.xlu1 %1564 }
 0x7e4   : > { %v1570_v48 = vsel %vm1062_vm5, %v1565_v40, 0 }
 0x7e6   : > { %v3216_v37 = vpop.eup %3215 }
 0x7e7   : > { %v3218_v39 = vpop.eup %3217  ;;  %v1450_v41 = vmul.f32 %v3216_v37, %v3210_v18 }
 0x7e8   : > { %v1449_v42 = vmul.f32 %v3218_v39, %v3208_v15 }
 0x7ea   : > { %v1453_v47 = vpack.c.bf16 %v1450_v41, %v1449_v42 }
 0x80f   : > { %v1441_v38 = vpop.xlane.xlu0 %1440 }
 0x810   : > { %3219 = vrcp.f32 %v1441_v38 }
 0x813   : > { %v1456_v43 = vpop.permute.xlu0 %1455 }
 0x814   : > { %v1444_v45 = vpop.xlane.xlu1 %1443  ;;  %2982 = vmatpush3.bf16.msra.mxu1 %v1456_v43 }
 0x815   : > { %3221 = vrcp.f32 %v1444_v45  ;;  %2993 = vmatprep.subr.bf16.mxu1 %v3379_v17 }
 0x817   : > { %2984 = vmatmul.mubr.msk.bf16.vlgmr.msra.gmra.mrb[8].mxu1 %vm1160_vm8, %v1453_v47  ;;  %v1563_v55 = vpop.permute.xlu0 %1562 }
 0x818   : > { %2995 = vmatprep.mubr.msk.bf16.mxu1 %vm3380_vm4, %v3379_v17  ;;  %v1616_v53 = vpop.permute.xlu1 %1615 }
 0x819   : > { %v1621_v56 = vsel %vm1062_vm5, %v1616_v53, 0 }
 0x81a   : > { %v3220_v49 = vpop.eup %3219 }
 0x81b   : > { %v1451_v51 = vmul.f32 %v3220_v49, %v3212_v26 }
 0x81c   : > { %v1614_v57 = vpop.permute.xlu1 %1613 }
 0x81d   : > { %2994 = vmatpush3.bf16.xpose.msra.mxu1 %v1570_v48 }
 0x81e   : > { %3005 = vmatprep.subr.bf16.mxu1 %v3379_v17 }
 0x81f   : > { %v3222_v50 = vpop.eup %3221 }
 0x820   : > { %v1452_v52 = vmul.f32 %v3222_v50, %v3214_v28 }
 0x822   : > { %v1454_v54 = vpack.c.bf16 %v1452_v52, %v1451_v51 }
 0x824   : > { %2990 = vmatmul.mubr.msk.bf16.vlgmr.msra.gmra.mrb[20].mxu0 %vm1160_vm8, %v1454_v54  ;;  %2996 = vmatmul.mubr.msk.bf16.vlgmr.msra.gmra.mrb[12].mxu1 %vm1062_vm5, %v1563_v55 }
 0x825   : > { %3000 = vmatpush3.bf16.xpose.msra.mxu0 %v1621_v56  ;;  %3001 = vmatprep.mubr.msk.bf16.mxu0 %vm3380_vm4, %v3379_v17 }
 0x826   : > { %3011 = vmatprep.subr.bf16.mxu0 %v3379_v17  ;;  %3007 = vmatprep.mubr.msk.bf16.mxu1 %vm3380_vm4, %v3379_v17 }
 0x82c   : > { %3002 = vmatmul.mubr.msk.bf16.vlgmr.msra.gmra.mrb[24].mxu0 %vm1062_vm5, %v1614_v57 }
 0x82d   : > { %3013 = vmatprep.mubr.msk.bf16.mxu0 %vm3380_vm4, %v3379_v17 }
 0x8ea   : > { %v3777_v58 = vpop.f32.mrb[8].mxu1 }
 0x8eb   : > { %v2985_v59 = vpop.f32.mrb[9].mxu1 }
 0x8ec   : > { %v3779_v60 = vpop.f32.mrb[10].mxu1 }
 0x8ed   : > { %v1549_v61 = vpack.c.bf16 %v3779_v60, %v3777_v58  ;;  %v2986_v62 = vpop.f32.mrb[11].mxu1 }
 0x8f7   : > { %v3783_v63 = vpop.f32.mrb[20].mxu0  ;;  %v1606_v0 = vpop.f32.mrb[12].mxu1 }
 0x8f8   : > { %v1607_v1 = vadd.f32 %v1606_v0, %v3697_v44  ;;  %v2991_v2 = vpop.f32.mrb[21].mxu0  ;;  %v2997_v3 = vpop.f32.mrb[13].mxu1 }
 0x8f9   : > { %v3786_v4 = vpop.f32.mrb[22].mxu0  ;;  %v1609_v5 = vpop.f32.mrb[14].mxu1 }
 0x8fa   : > { %v1550_v6 = vpack.c.bf16 %v3786_v4, %v3783_v63  ;;  %v1610_v7 = vadd.f32 %v1609_v5, %v3699_v46  ;;  %v2992_v8 = vpop.f32.mrb[23].mxu0  ;;  %v2998_v9 = vpop.f32.mrb[15].mxu1  ;;  %v1664_v10 = vsel %vm1160_vm8, %v1607_v1, -inf }
 0x8fb   : > { %1665 = vmax.xlane.f32.xlu0 %v1664_v10 }
 0x8fc   : > { %v1667_v11 = vsel %vm1160_vm8, %v1610_v7, -inf }
 0x8fd   : > { %1668 = vmax.xlane.f32.xlu1 %v1667_v11 }
 0x8ff   : > { %v1657_v12 = vpop.f32.mrb[24].mxu0 }
 0x900   : > { %v1658_v13 = vadd.f32 %v1657_v12, %v3697_v44  ;;  %v3003_v14 = vpop.f32.mrb[25].mxu0 }
 0x901   : > { %v1660_v15 = vpop.f32.mrb[26].mxu0 }
 0x902   : > { %v1661_v16 = vadd.f32 %v1660_v15, %v3699_v46  ;;  %v3004_v18 = vpop.f32.mrb[27].mxu0  ;;  %v1670_v19 = vsel %vm1160_vm8, %v1658_v13, -inf }
 0x903   : > { %1671 = vmax.xlane.f32.xlu0 %v1670_v19 }
 0x904   : > { %v1673_v20 = vsel %vm1160_vm8, %v1661_v16, -inf }
 0x907   : > { %1674 = vmax.xlane.f32.xlu0 %v1673_v20 }
 0x988   : > { %v1666_v21 = vpop.xlane.xlu0 %1665 }
 0x989   : > { %v1676_v22 = vsub.f32 %v1607_v1, %v1666_v21 }
 0x98a   : > { %v1669_v23 = vpop.xlane.xlu1 %1668 }
 0x98b   : > { %v1680_v24 = vmul.f32 1.442695, %v1676_v22  ;;  %v1677_v25 = vsub.f32 %v1610_v7, %v1669_v23 }
 0x98d   : > { %3223 = vpow2.f32 %v1680_v24  ;;  %v1682_v26 = vmul.f32 1.442695, %v1677_v25 }
 0x98f   : > { %3225 = vpow2.f32 %v1682_v26 }
 0x990   : > { %v1672_v27 = vpop.xlane.xlu0 %1671 }
 0x991   : > { %v1678_v28 = vsub.f32 %v1658_v13, %v1672_v27 }
 0x993   : > { %v1684_v30 = vmul.f32 1.442695, %v1678_v28 }
 0x994   : > { %v1675_v40 = vpop.xlane.xlu0 %1674 }
 0x995   : > { %3227 = vpow2.f32 %v1684_v30  ;;  %v1679_v41 = vsub.f32 %v1661_v16, %v1675_v40 }
 0x997   : > { %v3224_v31 = vpop.eup %3223  ;;  %v1686_v42 = vmul.f32 1.442695, %v1679_v41 }
 0x998   : > { %v1688_v35 = vsel %vm1160_vm8, %v3224_v31, 0.0 }
 0x999   : > { %v3226_v36 = vpop.eup %3225  ;;  %1689 = vadd.xlane.f32.xlu0 %v1688_v35  ;;  %3229 = vpow2.f32 %v1686_v42 }
 0x99a   : > { %v1691_v37 = vsel %vm1160_vm8, %v3226_v36, 0.0 }
 0x99b   : > { %1692 = vadd.xlane.f32.xlu1 %v1691_v37 }
 0x99f   : > { %v3228_v38 = vpop.eup %3227 }
 0x9a0   : > { %v1694_v39 = vsel %vm1160_vm8, %v3228_v38, 0.0 }
 0x9a1   : > { %1695 = vadd.xlane.f32.xlu0 %v1694_v39 }
 0x9a3   : > { %v3230_v43 = vpop.eup %3229 }
 0x9a4   : > { %v1697_v45 = vsel %vm1160_vm8, %v3230_v43, 0.0 }
 0x9ac   : > { %1757 = vrot.lane.b32.xlu1 %v3675_v29, %s3389_s5 }
 0x9b0   : > { %1819 = vrot.lane.b32.xlu1 %v3677_v32, %s3390_s8 }
 0x9b7   : > { %1710 = vrot.lane.b32.xlu0 %v3677_v32, %s3389_s5 }
 0x9bb   : > { %1817 = vrot.lane.b32.xlu0 %v3682_v34, %s3391_s0 }
 0x9d4   : > { %1698 = vadd.xlane.f32.xlu1 %v1697_v45 }
 0x9e5   : > { %1870 = vrot.lane.b32.xlu1 %v3675_v29, %s3390_s8 }
 0x9e9   : > { %1868 = vrot.lane.b32.xlu1 %v3679_v33, %s3391_s0 }
 0xa26   : > { %v1690_v47 = vpop.xlane.xlu0 %1689 }
 0xa27   : > { %3231 = vrcp.f32 %v1690_v47 }
 0xa28   : > { %v1693_v48 = vpop.xlane.xlu1 %1692 }
 0xa29   : > { %3233 = vrcp.f32 %v1693_v48 }
 0xa2c   : > { %v1758_v49 = vpop.permute.xlu1 %1757 }
 0xa2d   : > { %3012 = vmatpush3.bf16.msra.mxu0 %v1758_v49 }
 0xa2e   : > { %v1696_v50 = vpop.xlane.xlu0 %1695  ;;  %3023 = vmatprep.subr.bf16.mxu0 %v3379_v17 }
 0xa2f   : > { %3235 = vrcp.f32 %v1696_v50 }
 0xa30   : > { %v1820_v56 = vpop.permute.xlu1 %1819 }
 0xa31   : > { %v3232_v34 = vpop.eup %3231  ;;  %v1825_v33 = vsel %vm1062_vm5, %v1820_v56, 0 }
 0xa32   : > { %v1711_v51 = vpop.permute.xlu0 %1710  ;;  %v1704_v53 = vmul.f32 %v3232_v34, %v3224_v31 }
 0xa33   : > { %v3234_v52 = vpop.eup %3233  ;;  %3006 = vmatpush3.bf16.msra.mxu1 %v1711_v51 }
 0xa34   : > { %v1705_v54 = vmul.f32 %v3234_v52, %v3226_v36  ;;  %3017 = vmatprep.subr.bf16.mxu1 %v3379_v17 }
 0xa36   : > { %v1708_v55 = vpack.c.bf16 %v1705_v54, %v1704_v53  ;;  %v1818_v57 = vpop.permute.xlu0 %1817 }
 0xa38   : > { %3008 = vmatmul.mubr.msk.bf16.vlgmr.msra.gmra.mrb[16].mxu1 %vm1160_vm8, %v1708_v55 }
 0xa39   : > { %3019 = vmatprep.mubr.msk.bf16.mxu1 %vm3380_vm4, %v3379_v17  ;;  %v3236_v62 = vpop.eup %3235 }
 0xa3a   : > { %v1706_v1 = vmul.f32 %v3236_v62, %v3228_v38 }
 0xa3c   : > { %3018 = vmatpush3.bf16.xpose.msra.mxu1 %v1825_v33 }
 0xa3d   : > { %3029 = vmatprep.subr.bf16.mxu1 %v3379_v17 }
 0xa43   : > { %3020 = vmatmul.mubr.msk.bf16.vlgmr.msra.gmra.mrb[20].mxu1 %vm1062_vm5, %v1818_v57 }
 0xa44   : > { %3031 = vmatprep.mubr.msk.bf16.mxu1 %vm3380_vm4, %v3379_v17 }
 0xa61   : > { %v1699_v59 = vpop.xlane.xlu1 %1698 }
 0xa62   : > { %3237 = vrcp.f32 %v1699_v59 }
 0xa65   : > { %v1871_v3 = vpop.permute.xlu1 %1870 }
 0xa66   : > { %v1876_v7 = vsel %vm1062_vm5, %v1871_v3, 0 }
 0xa69   : > { %v1869_v8 = vpop.permute.xlu1 %1868 }
 0xa6c   : > { %v3238_v0 = vpop.eup %3237 }
 0xa6d   : > { %v1707_v2 = vmul.f32 %v3238_v0, %v3230_v43 }
 0xa6f   : > { %v1709_v5 = vpack.c.bf16 %v1707_v2, %v1706_v1 }
 0xa71   : > { %3014 = vmatmul.mubr.msk.bf16.vlgmr.msra.gmra.mrb[28].mxu0 %vm1160_vm8, %v1709_v5 }
 0xa72   : > { %3024 = vmatpush3.bf16.xpose.msra.mxu0 %v1876_v7  ;;  %3025 = vmatprep.mubr.msk.bf16.mxu0 %vm3380_vm4, %v3379_v17 }
 0xa73   : > { %3035 = vmatprep.subr.bf16.mxu0 %v3379_v17 }
 0xa79   : > { %3026 = vmatmul.mubr.msk.bf16.vlgmr.msra.gmra.mrb[32].mxu0 %vm1062_vm5, %v1869_v8 }
 0xa7a   : > { %3037 = vmatprep.mubr.msk.bf16.mxu0 %vm3380_vm4, %v3379_v17 }
 0xb0b   : > { %v3825_v9 = vpop.f32.mrb[16].mxu1 }
 0xb0c   : > { %v3009_v10 = vpop.f32.mrb[17].mxu1 }
 0xb0d   : > { %v1753_v11 = vpop.f32.mrb[18].mxu1 }
 0xb0e   : > { %v1804_v12 = vpack.c.bf16 %v1753_v11, %v3825_v9  ;;  %v3010_v13 = vpop.f32.mrb[19].mxu1 }
 0xb16   : > { %v1861_v14 = vpop.f32.mrb[20].mxu1 }
 0xb17   : > { %v1862_v15 = vadd.f32 %v1861_v14, %v3697_v44  ;;  %v3021_v16 = vpop.f32.mrb[21].mxu1 }
 0xb18   : > { %v1864_v18 = vpop.f32.mrb[22].mxu1  ;;  %v3171_v16 = vld [vmem:[%s3594_s26] sm:$0xff]  }
 0xb19   : > { %v1865_v19 = vadd.f32 %v1864_v18, %v3699_v46  ;;  %v3022_v20 = vpop.f32.mrb[23].mxu1  ;;  %v1919_v21 = vsel %vm1160_vm8, %v1862_v15, -inf  ;;  %v3172_v18 = vld [vmem:[%s3594_s26 + $0x8] sm:$0xff]  }
 0xb1a   : > { %1920 = vmax.xlane.f32.xlu0 %v1919_v21 }
 0xb1b   : > { %v1922_v17 = vsel %vm1160_vm8, %v1865_v19, -inf }
 0xb1c   : > { %1923 = vmax.xlane.f32.xlu1 %v1922_v17 }
 0xb44   : > { %v1797_v22 = vpop.f32.mrb[28].mxu0 }
 0xb45   : > { %v3015_v23 = vpop.f32.mrb[29].mxu0 }
 0xb46   : > { %v1800_v24 = vpop.f32.mrb[30].mxu0 }
 0xb47   : > { %v1805_v25 = vpack.c.bf16 %v1800_v24, %v1797_v22  ;;  %v3016_v26 = vpop.f32.mrb[31].mxu0 }
 0xb4c   : > { %v1912_v27 = vpop.f32.mrb[32].mxu0 }
 0xb4d   : > { %v1913_v28 = vadd.f32 %v1912_v27, %v3697_v44  ;;  %v3027_v30 = vpop.f32.mrb[33].mxu0  ;;  %v2829_v27 = vld [vmem:[%s4085_s29] ss:$0 sm:$0xff] }
 0xb4e   : > { %v1915_v31 = vpop.f32.mrb[34].mxu0 }
 0xb4f   : > { %v1916_v35 = vadd.f32 %v1915_v31, %v3699_v46  ;;  %v3028_v36 = vpop.f32.mrb[35].mxu0  ;;  %v1925_v37 = vsel %vm1160_vm8, %v1913_v28, -inf }
 0xb50   : > { %1926 = vmax.xlane.f32.xlu0 %v1925_v37 }
 0xb51   : > { %v1928_v38 = vsel %vm1160_vm8, %v1916_v35, -inf }
 0xb54   : > { %1929 = vmax.xlane.f32.xlu0 %v1928_v38  ;;  %v3271_v38 = vld [vmem:[#allocation2] sm:$0xff] }
 0xba7   : > { %v1921_v39 = vpop.xlane.xlu0 %1920 }
 0xba8   : > { %v1931_v40 = vsub.f32 %v1862_v15, %v1921_v39 }
 0xba9   : > { %v1924_v41 = vpop.xlane.xlu1 %1923 }
 0xbaa   : > { %v1935_v42 = vmul.f32 1.442695, %v1931_v40  ;;  %v1932_v43 = vsub.f32 %v1865_v19, %v1924_v41  ;;  %v3272_v41 = vld [vmem:[#allocation2 + $0x10] sm:$0xff] }
 0xbac   : > { %3239 = vpow2.f32 %v1935_v42  ;;  %v1937_v45 = vmul.f32 1.442695, %v1932_v43 }
 0xbae   : > { %3241 = vpow2.f32 %v1937_v45  ;;  %v3273_v45 = vld [vmem:[#allocation2 + $0x8] sm:$0xff] }
 0xbb6   : > { %v3240_v44 = vpop.eup %3239 }
 0xbb7   : > { %v1943_v47 = vsel %vm1160_vm8, %v3240_v44, 0.0 }
 0xbb8   : > { %v3242_v48 = vpop.eup %3241  ;;  %1944 = vadd.xlane.f32.xlu0 %v1943_v47 }
 0xbb9   : > { %v1946_v46 = vsel %vm1160_vm8, %v3242_v48, 0.0 }
 0xbba   : > { %1947 = vadd.xlane.f32.xlu1 %v1946_v46  ;;  %v3274_v46 = vld [vmem:[#allocation2 + $0x18] sm:$0xff] }
 0xbdd   : > { %v1927_v49 = vpop.xlane.xlu0 %1926 }
 0xbde   : > { %v1933_v50 = vsub.f32 %v1913_v28, %v1927_v49 }
 0xbe0   : > { %v1939_v34 = vmul.f32 1.442695, %v1933_v50 }
 0xbe1   : > { %v1930_v51 = vpop.xlane.xlu0 %1929 }
 0xbe2   : > { %3243 = vpow2.f32 %v1939_v34  ;;  %v1934_v52 = vsub.f32 %v1916_v35, %v1930_v51 }
 0xbe4   : > { %v1941_v53 = vmul.f32 1.442695, %v1934_v52 }
 0xbe6   : > { %3245 = vpow2.f32 %v1941_v53 }
 0xbec   : > { %v3244_v54 = vpop.eup %3243 }
 0xbed   : > { %v1949_v55 = vsel %vm1160_vm8, %v3244_v54, 0.0 }
 0xbee   : > { %1950 = vadd.xlane.f32.xlu0 %v1949_v55 }
 0xbf0   : > { %v3246_v56 = vpop.eup %3245 }
 0xbf1   : > { %v1952_v33 = vsel %vm1160_vm8, %v3246_v56, 0.0 }
 0xbf2   : > { %1953 = vadd.xlane.f32.xlu1 %v1952_v33 }
 0xc03   : > { %2012 = vrot.lane.b32.xlu1 %v3675_v29, %s3392_s30 }
 0xc04   : > { %1965 = vrot.lane.b32.xlu0 %v3677_v32, %s3392_s30  ;;  %s4089_s30 = sld [smem:[#allocation24_spill]] (!%p2850_p1) }
 0xc07   : > { %1553 = vrot.lane.b32.xlu1 %v1549_v61, %s3393_s10 }
 0xc08   : > { %1808 = vrot.lane.b32.xlu0 %v1804_v12, %s3394_s28 }
 0xc0b   : > { %1555 = vrot.lane.b32.xlu1 %v1550_v6, %s3393_s10 }
 0xc0f   : > { %1810 = vrot.lane.b32.xlu1 %v1805_v25, %s3394_s28 }
 0xc45   : > { %v1945_v59 = vpop.xlane.xlu0 %1944 }
 0xc47   : > { %v1948_v57 = vpop.xlane.xlu1 %1947 }
 0xc48   : > { %3247 = vrcp.f32 %v1948_v57 }
 0xc49   : > { %3249 = vrcp.f32 %v1945_v59 }
 0xc52   : > { %v3248_v62 = vpop.eup %3247 }
 0xc53   : > { %v3250_v0 = vpop.eup %3249  ;;  %v1960_v32 = vmul.f32 %v3248_v62, %v3242_v48 }
 0xc54   : > { %v1959_v1 = vmul.f32 %v3250_v0, %v3240_v44 }
 0xc56   : > { %v1963_v60 = vpack.c.bf16 %v1960_v32, %v1959_v1 }
 0xc7b   : > { %v1951_v29 = vpop.xlane.xlu0 %1950 }
 0xc7c   : > { %3251 = vrcp.f32 %v1951_v29 }
 0xc7f   : > { %v1954_v2 = vpop.xlane.xlu1 %1953  ;;  %v1966_v58 = vpop.permute.xlu0 %1965 }
 0xc80   : > { %3253 = vrcp.f32 %v1954_v2  ;;  %3030 = vmatpush3.bf16.msra.mxu1 %v1966_v58 }
 0xc81   : > { %3041 = vmatprep.subr.bf16.mxu1 %v3171_v16 }
 0xc83   : > { %v2013_v61 = vpop.permute.xlu1 %2012  ;;  %3032 = vmatmul.mubr.msk.bf16.vlgmr.msra.gmra.mrb[24].mxu1 %vm1160_vm8, %v1963_v60  ;;  %v1809_v6 = vpop.permute.xlu0 %1808 }
 0xc84   : > { %3036 = vmatpush3.bf16.msra.mxu0 %v2013_v61  ;;  %3042 = vmatpush3.bf16.msra.mxu1 %v3171_v16 }
 0xc85   : > { %3043 = vmatprep.subr.bf16.mxu1 %v3172_v18 }
 0xc86   : > { %v3252_v4 = vpop.eup %3251 }
 0xc87   : > { %v1554_v63 = vpop.permute.xlu1 %1553  ;;  %v1961_v5 = vmul.f32 %v3252_v4, %v3244_v54 }
 0xc88   : > { %1560 = vst.msk [vmem:[#allocation3] sm:$0xff] %vm1559_vm9, %v1554_v63  ;;  %3044 = vmatpush3.bf16.msra.mxu1 %v3172_v18 }
 0xc89   : > { %1815 = vst.msk [vmem:[#allocation3] sm:$0xff] %vm1814_vm10, %v1809_v6  ;;  %v3173_v6 = vld [vmem:[%s3611_s19] sm:$0xff]  }
 0xc8a   : > { %v3254_v3 = vpop.eup %3253  ;;  %3049 = vmatprep.subr.bf16.mxu0 %v3173_v6 }
 0xc8b   : > { %v1962_v7 = vmul.f32 %v3254_v3, %v3246_v56  ;;  %v1556_v8 = vpop.permute.xlu1 %1555  ;;  %v3174_v3 = vld [vmem:[%s3611_s19 + $0x8] sm:$0xff]  }
 0xc8c   : > { %1561 = vst.msk [vmem:[#allocation3 + $0x8] sm:$0xff] %vm1559_vm9, %v1556_v8 }
 0xc8d   : > { %v1964_v9 = vpack.c.bf16 %v1962_v7, %v1961_v5 }
 0xc8f   : > { %v1811_v10 = vpop.permute.xlu1 %1810  ;;  %3038 = vmatmul.mubr.msk.bf16.vlgmr.msra.gmra.mrb[36].mxu0 %vm1160_vm8, %v1964_v9 }
 0xc90   : > { %1816 = vst.msk [vmem:[#allocation3 + $0x8] sm:$0xff] %vm1814_vm10, %v1811_v10  ;;  %3050 = vmatpush3.bf16.msra.mxu0 %v3173_v6 }
 0xc91   : > { %3051 = vmatprep.subr.bf16.mxu0 %v3174_v3 }
 0xc94   : > { %3052 = vmatpush3.bf16.msra.mxu0 %v3174_v3 }
 0xd56   : > { %v2005_v11 = vpop.f32.mrb[24].mxu1 }
 0xd57   : > { %v3033_v12 = vpop.f32.mrb[25].mxu1 }
 0xd58   : > { %v2008_v13 = vpop.f32.mrb[26].mxu1 }
 0xd59   : > { %v2059_v14 = vpack.c.bf16 %v2008_v13, %v2005_v11  ;;  %v3034_v15 = vpop.f32.mrb[27].mxu1 }
 0xd5b   : > { %2063 = vrot.lane.b32.xlu0 %v2059_v14, %s3395_s27 }
 0xd62   : > { %v2052_v19 = vpop.f32.mrb[36].mxu0 }
 0xd63   : > { %v3039_v20 = vpop.f32.mrb[37].mxu0 }
 0xd64   : > { %v2055_v21 = vpop.f32.mrb[38].mxu0  ;;  %v2834_v20 = vld [vmem:[%s4087_s3] ss:$0 sm:$0xff] }
 0xd65   : > { %v2060_v17 = vpack.c.bf16 %v2055_v21, %v2052_v19  ;;  %v3040_v22 = vpop.f32.mrb[39].mxu0 }
 0xd67   : > { %2065 = vrot.lane.b32.xlu1 %v2060_v17, %s3395_s27  ;;  %s4090_s27 = sld [smem:[#allocation25_spill]] (!%p2850_p1) }
 0xdcd   : > { %v2064_v23 = vpop.permute.xlu0 %2063 }
 0xdce   : > { %2070 = vst.msk [vmem:[#allocation3] sm:$0xff] %vm2069_vm11, %v2064_v23 }
 0xdd5   : > { %v2072_v24 = vld [vmem:[#allocation3] sm:$0xff] }
 0xdd6   : > { %3045 = vmatprep.mubr.msk.bf16.mxu1 %vm897_vm3, %v2072_v24 }
 0xdd9   : > { %v2066_v25 = vpop.permute.xlu1 %2065 }
 0xdda   : > { %2071 = vst.msk [vmem:[#allocation3 + $0x8] sm:$0xff] %vm2069_vm11, %v2066_v25  ;;  %v2835_v25 = vld [vmem:[%s766_s20] ss:$0 sm:$0xff] }
 0xde1   : > { %v2073_v26 = vld [vmem:[#allocation3 + $0x8] sm:$0xff] }
 0xde2   : > { %3046 = vmatmul.mubr.msk.bf16.vlgmr.msra.gmra.mrb[28].mxu1 %vm897_vm3, %v2073_v26 }
 0xeb5   : > { %v3047_v28 = vpop.f32.mrb[28].mxu1 }
 0xeb6   : > { %v2137_v30 = vpop.f32.mrb[29].mxu1  ;;  %v2146_v31 = vadd.f32 %v3047_v28, %v2829_v27 }
 0xeb7   : > { %v2138_v35 = vadd.f32 %v2829_v27, %v2137_v30  ;;  %v3048_v36 = vpop.f32.mrb[30].mxu1 }
 0xeb8   : > { %v2140_v37 = vpop.f32.mrb[31].mxu1  ;;  %v3861_v42 = vadd.f32 %v3272_v41, %v2146_v31  ;;  %v2149_v43 = vadd.f32 %v3048_v36, %v2829_v27 }
 0xeb9   : > { %v3859_v39 = vadd.f32 %v3271_v38, %v2138_v35  ;;  %v2141_v40 = vadd.f32 %v2829_v27, %v2140_v37 }
 0xeba   : > { %v3869_v49 = vadd.f32 %v3274_v46, %v2149_v43  ;;  %v2164_v50 = vsel %vm897_vm3, %v3861_v42, 0.0  ;;  %v3178_v46 = vld [vmem:[%s3625_s12 + $0x18] sm:$0xff]  }
 0xebb   : > { %v3863_v44 = vadd.f32 %v3273_v45, %v2141_v40  ;;  %v2158_v47 = vsel %vm897_vm3, %v3859_v39, 0.0  ;;  %v3175_v45 = vld [vmem:[%s3625_s12] sm:$0xff]  }
 0xebc   : > { %2159 = vadd.xlane.f32.xlu0 %v2158_v47  ;;  %v2167_v34 = vsel %vm897_vm3, %v3869_v49, 0.0  ;;  %3057 = vmatprep.subr.bf16.mxu1 %v3175_v45  ;;  %v3176_v47 = vld [vmem:[%s3625_s12 + $0x8] sm:$0xff]  }
 0xebd   : > { %v2161_v48 = vsel %vm897_vm3, %v3863_v44, 0.0  ;;  %3058 = vmatpush3.bf16.msra.mxu1 %v3175_v45 }
 0xebe   : > { %2162 = vadd.xlane.f32.xlu1 %v2161_v48  ;;  %3059 = vmatprep.subr.bf16.mxu1 %v3176_v47  ;;  %v3177_v48 = vld [vmem:[%s3625_s12 + $0x10] sm:$0xff]  }
 0xec0   : > { %2165 = vadd.xlane.f32.xlu0 %v2164_v50  ;;  %v3179_v50 = vld [vmem:[%s3625_s12 + $0x20] sm:$0xff]  }
 0xec1   : > { %3060 = vmatpush3.bf16.msra.mxu1 %v3176_v47 }
 0xec2   : > { %3061 = vmatprep.subr.bf16.mxu1 %v3177_v48 }
 0xec4   : > { %2168 = vadd.xlane.f32.xlu0 %v2167_v34  ;;  %v3180_v34 = vld [vmem:[%s3625_s12 + $0x28] sm:$0xff]  }
 0xec5   : > { %3062 = vmatpush3.bf16.msra.mxu1 %v3177_v48 }
 0xec6   : > { %3063 = vmatprep.subr.bf16.mxu1 %v3178_v46 }
 0xec9   : > { %3064 = vmatpush3.bf16.msra.mxu1 %v3178_v46 }
 0xeca   : > { %3065 = vmatprep.subr.bf16.mxu1 %v3179_v50 }
 0xecd   : > { %3066 = vmatpush3.bf16.msra.mxu1 %v3179_v50 }
 0xece   : > { %3067 = vmatprep.subr.bf16.mxu1 %v3180_v34 }
 0xed1   : > { %3068 = vmatpush3.bf16.msra.mxu1 %v3180_v34 }
 0xf49   : > { %v2160_v51 = vpop.xlane.xlu0 %2159 }
 0xf4a   : > { %v2170_v52 = vmul.f32 0.03125, %v2160_v51  ;;  %v3181_v51 = vld [vmem:[%s3625_s12 + $0x30] sm:$0xff]  }
 0xf4b   : > { %v2163_v53 = vpop.xlane.xlu1 %2162  ;;  %3069 = vmatprep.subr.bf16.mxu1 %v3181_v51 }
 0xf4c   : > { %v2174_v54 = vsub.f32 %v3859_v39, %v2170_v52  ;;  %v2171_v55 = vmul.f32 0.03125, %v2163_v53  ;;  %v3182_v52 = vld [vmem:[%s3625_s12 + $0x38] sm:$0xff]   ;;  %3070 = vmatpush3.bf16.msra.mxu1 %v3181_v51  ;;  %v2836_v53 = vld [vmem:[%s774_s16] ss:$0 sm:$0xff] }
 0xf4d   : > { %v2166_v56 = vpop.xlane.xlu0 %2165  ;;  %3071 = vmatprep.subr.bf16.mxu1 %v3182_v52 }
 0xf4e   : > { %v2175_v33 = vsub.f32 %v3863_v44, %v2171_v55  ;;  %v2172_v57 = vmul.f32 0.03125, %v2166_v56  ;;  %v2178_v59 = vmul.f32 %v2174_v54, %v2174_v54 }
 0xf50   : > { %v2176_v62 = vsub.f32 %v3861_v42, %v2172_v57  ;;  %v2182_v29 = vsel %vm897_vm3, %v2178_v59, 0.0  ;;  %v2179_v0 = vmul.f32 %v2175_v33, %v2175_v33  ;;  %3072 = vmatpush3.bf16.msra.mxu1 %v3182_v52 }
 0xf51   : > { %2183 = vadd.xlane.f32.xlu0 %v2182_v29  ;;  %v2169_v32 = vpop.xlane.xlu0 %2168 }
 0xf52   : > { %v2173_v1 = vmul.f32 0.03125, %v2169_v32  ;;  %v2185_v2 = vsel %vm897_vm3, %v2179_v0, 0.0  ;;  %v2180_v58 = vmul.f32 %v2176_v62, %v2176_v62 }
 0xf53   : > { %2186 = vadd.xlane.f32.xlu1 %v2185_v2 }
 0xf54   : > { %v2177_v60 = vsub.f32 %v3869_v49, %v2173_v1  ;;  %v2188_v61 = vsel %vm897_vm3, %v2180_v58, 0.0 }
 0xf55   : > { %2189 = vadd.xlane.f32.xlu0 %v2188_v61 }
 0xf56   : > { %v2181_v63 = vmul.f32 %v2177_v60, %v2177_v60 }
 0xf58   : > { %v2191_v4 = vsel %vm897_vm3, %v2181_v63, 0.0 }
 0xf59   : > { %2192 = vadd.xlane.f32.xlu1 %v2191_v4 }
 0xfde   : > { %v2184_v5 = vpop.xlane.xlu0 %2183 }
 0xfdf   : > { %v2194_v7 = vmul.f32 0.03125, %v2184_v5 }
 0xfe0   : > { %v2187_v8 = vpop.xlane.xlu1 %2186 }
 0xfe1   : > { %v2198_v9 = vadd.f32 1e-05, %v2194_v7  ;;  %v2195_v10 = vmul.f32 0.03125, %v2187_v8 }
 0xfe2   : > { %v2190_v11 = vpop.xlane.xlu0 %2189 }
 0xfe3   : > { %3255 = vrsqrt.f32 %v2198_v9  ;;  %v2199_v12 = vadd.f32 1e-05, %v2195_v10  ;;  %v2196_v13 = vmul.f32 0.03125, %v2190_v11 }
 0xfe5   : > { %3257 = vrsqrt.f32 %v2199_v12  ;;  %v2200_v14 = vadd.f32 1e-05, %v2196_v13 }
 0xfe6   : > { %v2193_v15 = vpop.xlane.xlu1 %2192 }
 0xfe7   : > { %3259 = vrsqrt.f32 %v2200_v14  ;;  %v2197_v16 = vmul.f32 0.03125, %v2193_v15 }
 0xfe9   : > { %v2201_v18 = vadd.f32 1e-05, %v2197_v16 }
 0xfeb   : > { %3261 = vrsqrt.f32 %v2201_v18 }
 0xfed   : > { %v3256_v19 = vpop.eup %3255 }
 0xfee   : > { %v2206_v21 = vmul.f32 %v3256_v19, %v2174_v54 }
 0xfef   : > { %v3258_v17 = vpop.eup %3257 }
 0xff0   : > { %v2207_v22 = vmul.f32 %v3258_v17, %v2175_v33  ;;  %v2216_v23 = vmul.f32 %v2834_v20, %v2206_v21 }
 0xff1   : > { %v3260_v24 = vpop.eup %3259 }
 0xff2   : > { %v2208_v26 = vmul.f32 %v3260_v24, %v2176_v62  ;;  %v2217_v27 = vmul.f32 %v2834_v20, %v2207_v22  ;;  %v2226_v28 = vadd.f32 %v2835_v25, %v2216_v23 }
 0xff4   : > { %v2227_v30 = vadd.f32 %v2835_v25, %v2217_v27  ;;  %v2218_v35 = vmul.f32 %v2834_v20, %v2208_v26 }
 0xff5   : > { %v3262_v31 = vpop.eup %3261 }
 0xff6   : > { %v2209_v36 = vmul.f32 %v3262_v31, %v2177_v60  ;;  %v2230_v37 = vpack.c.bf16 %v2227_v30, %v2226_v28  ;;  %v2228_v40 = vadd.f32 %v2835_v25, %v2218_v35 }
 0xff8   : > { %v2219_v38 = vmul.f32 %v2834_v20, %v2209_v36  ;;  %3053 = vmatprep.mubr.msk.bf16.mxu0 %vm897_vm3, %v2230_v37  ;;  %v2841_v37 = vld [vmem:[%s782_s18] ss:$0 sm:$0xff] }
 0xffa   : > { %v2229_v41 = vadd.f32 %v2835_v25, %v2219_v38 }
 0xffc   : > { %v2231_v43 = vpack.c.bf16 %v2229_v41, %v2228_v40 }
 0xffe   : > { %3054 = vmatmul.mubr.msk.bf16.vlgmr.msra.gmra.mrb[40].mxu0 %vm897_vm3, %v2231_v43 }
0x10d1   : > { %v3055_v54 = vpop.f32.mrb[40].mxu0 }
0x10d2   : > { %v2304_v55 = vadd.f32 %v3055_v54, %v2836_v53  ;;  %v2295_v56 = vpop.f32.mrb[41].mxu0 }
0x10d3   : > { %v2296_v33 = vadd.f32 %v2836_v53, %v2295_v56  ;;  %v3056_v57 = vpop.f32.mrb[42].mxu0 }
0x10d4   : > { %v2316_v59 = vmul.f32 %v2304_v55, %v2304_v55  ;;  %v2307_v62 = vadd.f32 %v3056_v57, %v2836_v53  ;;  %v2298_v29 = vpop.f32.mrb[43].mxu0  ;;  %v2312_v17 = vmul.f32 0.5, %v2304_v55 }
0x10d5   : > { %v2314_v0 = vmul.f32 %v2296_v33, %v2296_v33  ;;  %v2299_v32 = vadd.f32 %v2836_v53, %v2298_v29  ;;  %v2310_v24 = vmul.f32 0.5, %v2296_v33 }
0x10d6   : > { %v2320_v1 = vmul.f32 %v2316_v59, %v2304_v55  ;;  %v2317_v2 = vmul.f32 %v2307_v62, %v2307_v62  ;;  %v2313_v22 = vmul.f32 0.5, %v2307_v62 }
0x10d7   : > { %v2318_v58 = vmul.f32 %v2314_v0, %v2296_v33  ;;  %v2315_v60 = vmul.f32 %v2299_v32, %v2299_v32  ;;  %v2311_v25 = vmul.f32 0.5, %v2299_v32 }
0x10d8   : > { %v2324_v61 = vmul.f32 0.044715, %v2320_v1  ;;  %v2321_v63 = vmul.f32 %v2317_v2, %v2307_v62 }
0x10d9   : > { %v2322_v4 = vmul.f32 0.044715, %v2318_v58  ;;  %v2319_v6 = vmul.f32 %v2315_v60, %v2299_v32 }
0x10da   : > { %v2328_v3 = vadd.f32 %v2324_v61, %v2304_v55  ;;  %v2325_v5 = vmul.f32 0.044715, %v2321_v63 }
0x10db   : > { %v2326_v7 = vadd.f32 %v2322_v4, %v2296_v33  ;;  %v2323_v8 = vmul.f32 0.044715, %v2319_v6 }
0x10dc   : > { %v2332_v9 = vmul.f32 0.7978846, %v2328_v3  ;;  %v2329_v10 = vadd.f32 %v2325_v5, %v2307_v62 }
0x10dd   : > { %v2330_v11 = vmul.f32 0.7978846, %v2326_v7  ;;  %v2327_v12 = vadd.f32 %v2323_v8, %v2299_v32 }
0x10de   : > { %3263 = vtanh.f32 %v2332_v9  ;;  %v2333_v13 = vmul.f32 0.7978846, %v2329_v10 }
0x10df   : > { %3265 = vtanh.f32 %v2330_v11  ;;  %v2331_v14 = vmul.f32 0.7978846, %v2327_v12 }
0x10e0   : > { %3267 = vtanh.f32 %v2333_v13 }
0x10e1   : > { %3269 = vtanh.f32 %v2331_v14 }
0x10e8   : > { %v3264_v15 = vpop.eup %3263 }
0x10e9   : > { %v3266_v16 = vpop.eup %3265  ;;  %v2340_v18 = vadd.f32 1.0, %v3264_v15 }
0x10ea   : > { %v3268_v19 = vpop.eup %3267  ;;  %v2338_v20 = vadd.f32 1.0, %v3266_v16 }
0x10eb   : > { %v3270_v21 = vpop.eup %3269  ;;  %v2341_v23 = vadd.f32 1.0, %v3268_v19  ;;  %v2344_v27 = vmul.f32 %v2340_v18, %v2312_v17  ;;  %v2852_v17 = vld [vmem:[%s4090_s27] ss:$0 sm:$0xff] (!%p2850_p1) }
0x10ec   : > { %v2339_v26 = vadd.f32 1.0, %v3270_v21  ;;  %v2342_v30 = vmul.f32 %v2338_v20, %v2310_v24  ;;  %v2851_v20 = vld [vmem:[%s4089_s30] ss:$0 sm:$0xff] (!%p2850_p1) }
0x10ed   : > { %v2345_v28 = vmul.f32 %v2341_v23, %v2313_v22 }
0x10ee   : > { %v2343_v31 = vmul.f32 %v2339_v26, %v2311_v25 }
0x10ef   : > { %v2347_v35 = vpack.c.bf16 %v2345_v28, %v2344_v27 }
0x10f0   : > { %v2346_v36 = vpack.c.bf16 %v2343_v31, %v2342_v30 }
0x10f2   : > { %3073 = vmatprep.mubr.bf16.mxu1 %v2346_v36 }
0x10f3   : > { %3074 = vmatmul.mubr.bf16.vlgmr.msra.gmra.mrb[32].mxu1 %v2347_v35 }
0x11c6   : > { %v3075_v38 = vpop.f32.mrb[32].mxu1 }
0x11c7   : > { %v2462_v40 = vadd.f32 %v3075_v38, %v2841_v37  ;;  %v2453_v41 = vpop.f32.mrb[33].mxu1 }
0x11c8   : > { %v2454_v43 = vadd.f32 %v2841_v37, %v2453_v41  ;;  %v3076_v45 = vpop.f32.mrb[34].mxu1  ;;  %2479 = sbr.rel (%p2850_p1) target bundleno = 4880 (0x1310), region = 100 }
0x11c9   : > { %v2470_v47 = vadd.f32 %v2462_v40, %v3861_v42  ;;  %v2465_v48 = vadd.f32 %v3076_v45, %v2841_v37  ;;  %v2456_v46 = vpop.f32.mrb[35].mxu1 }
0x11ca   : > { %v2468_v50 = vadd.f32 %v2454_v43, %v3859_v39  ;;  %v2457_v34 = vadd.f32 %v2841_v37, %v2456_v46 }
0x11cb   : > { %2474 = vst.msk [vmem:[#allocation2 + $0x10] sm:$0xff] %vm897_vm3, %v2470_v47  ;;  %v2471_v51 = vadd.f32 %v2465_v48, %v3869_v49  ;;  %v2488_v39 = vsel (!%p2850_p1), %vm897_vm3, %v2470_v47, 0.0 }
0x11cc   : > { %2472 = vst.msk [vmem:[#allocation2] sm:$0xff] %vm897_vm3, %v2468_v50  ;;  %v2469_v52 = vadd.f32 %v2457_v34, %v3863_v44  ;;  %v2482_v42 = vsel (!%p2850_p1), %vm897_vm3, %v2468_v50, 0.0  ;;  %2489 = vadd.xlane.f32.xlu1 (!%p2850_p1), %v2488_v39 }
0x11cd   : > { %2475 = vst.msk [vmem:[#allocation2 + $0x18] sm:$0xff] %vm897_vm3, %v2471_v51  ;;  %2483 = vadd.xlane.f32.xlu0 (!%p2850_p1), %v2482_v42  ;;  %v2491_v49 = vsel (!%p2850_p1), %vm897_vm3, %v2471_v51, 0.0 }
0x11ce   : > { %2473 = vst.msk [vmem:[#allocation2 + $0x8] sm:$0xff] %vm897_vm3, %v2469_v52  ;;  %v2485_v53 = vsel (!%p2850_p1), %vm897_vm3, %v2469_v52, 0.0 }
0x11d0   : > { %2492 = vadd.xlane.f32.xlu1 %v2491_v49 }
0x11d1   : > { %2486 = vadd.xlane.f32.xlu0 %v2485_v53 }
0x1259   : > { %v2490_v54 = vpop.xlane.xlu1 %2489 }
0x125a   : > { %v2484_v44 = vpop.xlane.xlu0 %2483  ;;  %v2496_v56 = vmul.f32 0.03125, %v2490_v54 }
0x125b   : > { %v2494_v55 = vmul.f32 0.03125, %v2484_v44 }
0x125c   : > { %v2500_v57 = vsub.f32 %v2470_v47, %v2496_v56 }
0x125d   : > { %v2498_v33 = vsub.f32 %v2468_v50, %v2494_v55  ;;  %v2493_v62 = vpop.xlane.xlu1 %2492 }
0x125e   : > { %v2487_v59 = vpop.xlane.xlu0 %2486  ;;  %v2497_v0 = vmul.f32 0.03125, %v2493_v62  ;;  %v2504_v1 = vmul.f32 %v2500_v57, %v2500_v57 }
0x125f   : > { %v2495_v29 = vmul.f32 0.03125, %v2487_v59  ;;  %v2502_v32 = vmul.f32 %v2498_v33, %v2498_v33 }
0x1260   : > { %v2501_v58 = vsub.f32 %v2471_v51, %v2497_v0  ;;  %v2512_v61 = vsel %vm897_vm3, %v2504_v1, 0.0 }
0x1261   : > { %v2499_v2 = vsub.f32 %v2469_v52, %v2495_v29  ;;  %v2506_v60 = vsel %vm897_vm3, %v2502_v32, 0.0 }
0x1262   : > { %2507 = vadd.xlane.f32.xlu0 %v2506_v60  ;;  %v2505_v4 = vmul.f32 %v2501_v58, %v2501_v58 }
0x1263   : > { %v2503_v63 = vmul.f32 %v2499_v2, %v2499_v2 }
0x1264   : > { %v2515_v3 = vsel %vm897_vm3, %v2505_v4, 0.0 }
0x1265   : > { %v2509_v6 = vsel %vm897_vm3, %v2503_v63, 0.0 }
0x1266   : > { %2513 = vadd.xlane.f32.xlu0 %v2512_v61  ;;  %2510 = vadd.xlane.f32.xlu1 %v2509_v6 }
0x126a   : > { %2516 = vadd.xlane.f32.xlu1 %v2515_v3 }
0x12ef   : > { %v2508_v5 = vpop.xlane.xlu0 %2507 }
0x12f0   : > { %v2518_v7 = vmul.f32 0.03125, %v2508_v5 }
0x12f2   : > { %v2522_v8 = vadd.f32 1e-05, %v2518_v7 }
0x12f3   : > { %v2511_v9 = vpop.xlane.xlu1 %2510  ;;  %v2514_v10 = vpop.xlane.xlu0 %2513 }
0x12f4   : > { %3275 = vrsqrt.f32 %v2522_v8  ;;  %v2519_v11 = vmul.f32 0.03125, %v2511_v9  ;;  %v2520_v12 = vmul.f32 0.03125, %v2514_v10 }
0x12f6   : > { %v2523_v13 = vadd.f32 1e-05, %v2519_v11  ;;  %v2524_v14 = vadd.f32 1e-05, %v2520_v12 }
0x12f7   : > { %v2517_v15 = vpop.xlane.xlu1 %2516 }
0x12f8   : > { %3277 = vrsqrt.f32 %v2523_v13  ;;  %v2521_v16 = vmul.f32 0.03125, %v2517_v15 }
0x12f9   : > { %3279 = vrsqrt.f32 %v2524_v14 }
0x12fa   : > { %v2525_v18 = vadd.f32 1e-05, %v2521_v16 }
0x12fc   : > { %3281 = vrsqrt.f32 %v2525_v18 }
0x12fe   : > { %v3276_v19 = vpop.eup %3275 }
0x12ff   : > { %v2530_v21 = vmul.f32 %v3276_v19, %v2498_v33 }
0x1301   : > { %v2540_v22 = vmul.f32 %v2851_v20, %v2530_v21 }
0x1302   : > { %v3278_v23 = vpop.eup %3277 }
0x1303   : > { %v3280_v24 = vpop.eup %3279  ;;  %v2550_v25 = vadd.f32 %v2852_v17, %v2540_v22  ;;  %v2531_v26 = vmul.f32 %v3278_v23, %v2499_v2 }
0x1304   : > { %v2532_v27 = vmul.f32 %v3280_v24, %v2500_v57 }
0x1305   : > { %v2868_v28 = vpack.c.bf16 %v2550_v25, %v2550_v25  ;;  %v2541_v30 = vmul.f32 %v2851_v20, %v2531_v26 }
0x1306   : > { %v3282_v31 = vpop.eup %3281  ;;  %v2542_v35 = vmul.f32 %v2851_v20, %v2532_v27 }
0x1307   : > { %2571 = vst.msk [vmem:[%s3627_s4] sm:$0xf] %vm2570_vm12, %v2868_v28  ;;  %v2551_v36 = vadd.f32 %v2852_v17, %v2541_v30  ;;  %v2533_v37 = vmul.f32 %v3282_v31, %v2501_v58 }
0x1308   : > { %v2552_v38 = vadd.f32 %v2852_v17, %v2542_v35 }
0x1309   : > { %v2869_v40 = vpack.c.bf16 %v2551_v36, %v2551_v36  ;;  %v2543_v41 = vmul.f32 %v2851_v20, %v2533_v37 }
0x130a   : > { %v2870_v43 = vpack.c.bf16 %v2552_v38, %v2552_v38 }
0x130b   : > { %2572 = vst.msk [vmem:[%s3627_s4 + $0x4] sm:$0xf] %vm2570_vm12, %v2869_v40  ;;  %v2553_v45 = vadd.f32 %v2852_v17, %v2543_v41 }
0x130c   : > { %2573 = vst.msk [vmem:[%s3627_s4 + $0x8] sm:$0xf] %vm2570_vm12, %v2870_v43 }
0x130d   : > { %v2871_v47 = vpack.c.bf16 %v2553_v45, %v2553_v45 }
0x130f   : > { %2574 = vst.msk [vmem:[%s3627_s4 + $0xc] sm:$0xf] %vm2570_vm12, %v2871_v47 }
0x1310 PF: > { %s4091_s26 = sld [smem:[#allocation11_spill]]  ;;  %s4092_s23 = sld [smem:[#allocation8_spill]] }
0x1311   : > { %s4094_s3 = sld [smem:[#allocation30_spill]]  ;;  %s2590_s5 = sshll.u32 %s3627_s4, 4  ;;  %s3953_s5 = int_to_ptr.vmem [resolvable:$true] %s2590_s5 }
0x1312   : > { %s3283_s12 = scalar_lea.vmem %s3953_s5, 256  ;;  %s3396_s16 = smov [#allocation4]  }
0x1313   : > { %p3284_p2 = scmp.ne.s32.totalorder %s3953_s5, %s3283_s12  ;;  %s3287_s25 = sshll.u32 %s3396_s16, 4  ;;  %s3288_s25 = int_to_ptr.vmem [resolvable:$false] %s3287_s25 }
0x1314   : > { %s3289_s18 = scalar_lea.vmem %s3288_s25, 512  ;;  %p3290_p6 = scmp.lt.s32.totalorder %s3953_s5, %s3288_s25 }
0x1315   : > { %p3285_p4 = pnand %p3284_p2, %p3542_p3  ;;  %p3291_p7 = scmp.lt.s32.totalorder %s3289_s18, %s3283_s12 }
0x1316   : > { %s2873_s19 = sshll.u32 %s4091_s26, 8  ;;  %s4095_s20 = sand.u32 1, %s4092_s23  }
0x1317   : > { %s3950_s22 = scalar_lea.hbm %s4094_s3, %s2873_s19  ;;  %s3957_s8 = scalar_lea.sflag [#allocation5], %s4095_s20 }
0x1318   : > { %p3286_p5 = pneg %p3285_p4  ;;  %p3292_p8 = por %p3291_p7, %p3290_p6 }
0x131a   : > { %p3293_p10 = pnand %p3292_p8, %p3286_p5 }
0x131c   : > { %3296 = shalt.err (!%p3293_p10)
}
0x131d   : > { %s3297_s4 = scalar_lea.hbm %s3950_s22, 256  ;;  %s3301_s10 = scalar_lea.hbm %s4094_s3, 512 }
0x131e   : > { %p3298_p11 = scmp.ne.s32.totalorder %s3950_s22, %s3297_s4  ;;  %p3302_p0 = scmp.lt.u32.totalorder %s3950_s22, %s4094_s3 }
0x131f   : > { %p3303_p1 = scmp.lt.u32.totalorder %s3301_s10, %s3297_s4  ;;  %p3305_p4 = scmp.lt.u32.totalorder %s3297_s4, %s3950_s22 }
0x1320   : > { %p3299_p12 = pnand %p3298_p11, %p3542_p3 }
0x1321   : > { %p3304_p2 = por %p3303_p1, %p3302_p0 }
0x1322   : > { %p3300_p13 = pneg %p3299_p12 }
0x1323   : > { %p3306_p5 = por %p3305_p4, %p3304_p2 }
0x1325   : > { %p3307_p6 = pnand %p3306_p5, %p3300_p13 }
0x1327   : > { %3310 = shalt.err (!%p3307_p6)
}
0x1328   : > { %s3397_s26 = smov 4  }
0x1329   : > { %3078 = dma.vmem_to_hbm [thread:$0]  (%p3542_p3), %s3953_s5, 256, %s3950_s22, %s3957_s8, %s3383_s1, %s3383_s1, %s3397_s26  }
0x132a PF: > { %s4096_s23 = sld [smem:[#allocation14_spill]]  ;;  %s4097_s19 = sld [smem:[#allocation7_spill]] }
0x1330   : > { %p3084_p7 = scmp.ge.s32.totalorder %s4096_s23, 2  ;;  %s2605_s21 = sand.u32 1, %s4097_s19  }
0x1331   : > { %s2606_s20 = scalar_lea.sflag [#allocation5], %s2605_s21 }
0x1332   : > { %p3081_p8 = pnand %p3084_p7, %p3552_p9 }
0x1334   : > { %3344 = dma.done.wait (!%p3081_p8), %s2606_s20, 256  }
0x1335   : > { %3346 = vsyncadd (!%p3081_p8), %s2606_s20, 4294967040  ;;  %s31_s20 = sadd.s32 1, %s4096_s23   ;;  %s4099_s27 = sld [smem:[#allocation8_spill]] }
0x1336   : > { %p28_p10 = scmp.ge.s32.totalorder %s31_s20, 6   ;;  %s4100_s28 = sld [smem:[#allocation9_spill]] }
0x1337   : > { %s4101_s29 = sld [smem:[#allocation19_spill]]  ;;  %s4102_s30 = sld [smem:[#allocation12_spill]] }
0x1338   : > { %s4103_s0 = sld [smem:[#allocation13_spill]]  ;;  %s4104_s19 = sld [smem:[#allocation15_spill]] }
0x1339   : > { %s4105_s1 = sld [smem:[#allocation17_spill]]  ;;  %30 = sbr.rel (!%p28_p10) target bundleno = 17 (0x11), region = 171 }
0x1340   :  { %2611 = vsyncpa [#allocation5], 1 }
0x1341   :  { %2613 = vsyncpa [#allocation5 + $0x1], 1 }

</bundles_post_ra>
